<compile_context>
chip_gen: v6e
topology: v6e:2x2x1
jax: 0.10.0
libtpu: 0.0.40
codegen_flags: <defaults>
</compile_context>

<pallas_src>
import jax
import jax.numpy as jnp
import numpy as np
from jax.experimental import pallas as pl
from jax.experimental.pallas import tpu as pltpu


def cbam_kernel(x_ref, w1t_ref, w2t_ref, ka_ref, km_ref, b_ref, o_ref):
    x = x_ref[...]                                   # (nb, C, HW) f32
    nb, C, HW = x.shape

    # ---------------- channel attention ----------------
    avg = jnp.mean(x, axis=2)                        # (nb, C)  lane reduction
    mx = jnp.max(x, axis=2)                          # (nb, C)
    w1t = w1t_ref[...]                               # (C, Cr)
    w2t = w2t_ref[...]                               # (Cr, C)

    if nb >= 8:
        # Fused MLP: [avg; max] is sublane-aligned at nb >= 8.
        stats = jnp.concatenate([avg, mx], axis=0)   # (2*nb, C)
        h = jnp.maximum(
            jnp.dot(stats, w1t, preferred_element_type=jnp.float32), 0.0)
        mlp = jnp.dot(h, w2t, preferred_element_type=jnp.float32)
        mlp_sum = mlp[:nb] + mlp[nb:]                # (nb, C)
    else:
        # Small nb: avoid masked sublane concat/slice relayouts; the tiny MLP
        # (Cr = C // 16) is cheaper run twice.
        h_a = jnp.maximum(
            jnp.dot(avg, w1t, preferred_element_type=jnp.float32), 0.0)
        h_m = jnp.maximum(
            jnp.dot(mx, w1t, preferred_element_type=jnp.float32), 0.0)
        mlp_sum = (jnp.dot(h_a, w2t, preferred_element_type=jnp.float32)
                   + jnp.dot(h_m, w2t, preferred_element_type=jnp.float32))

    ca = jax.nn.sigmoid(mlp_sum)                     # (nb, C)
    out1 = x * ca[:, :, None]                        # (nb, C, HW)

    # ---------------- spatial attention ----------------
    # 7x7 conv (pad 3) folded into two dense bf16 matmuls + SMEM scalar bias.
    avg_c = jnp.mean(out1, axis=1).astype(ka_ref.dtype)   # (nb, HW) bf16
    max_c = jnp.max(out1, axis=1).astype(km_ref.dtype)    # (nb, HW) bf16
    conv = (jnp.dot(avg_c, ka_ref[...], preferred_element_type=jnp.float32)
            + jnp.dot(max_c, km_ref[...], preferred_element_type=jnp.float32)
            + b_ref[0])                              # (nb, HW) f32
    sa = jax.nn.sigmoid(conv)                        # (nb, HW)

    o_ref[...] = (out1 * sa[:, None, :]).astype(o_ref.dtype)


def _default_nb(N):
    """One block per TensorCore: nb = N on single-TC chips, N // 2 on 2-TC."""
    try:
        kind = jax.devices()[0].device_kind.lower()
    except Exception:
        kind = ""
    two_tc = any(t in kind for t in ("v7", "v4", "v5p")) and "lite" not in kind
    if two_tc and N >= 2 and N % 2 == 0:
        return N // 2
    return N


def origin_cbam(x, w1, w2, k_avg, k_max, bias, nb=None):
    N, C, H, W = x.shape
    HW = H * W
    Cr = w1.shape[0]

    if nb is None:
        nb = _default_nb(N)
    assert N % nb == 0

    x_flat = x.reshape(N, C, HW)                     # lane-dense layout
    w1t = w1.T                                       # (C, Cr)
    w2t = w2.T                                       # (Cr, C)

    out_flat = pl.pallas_call(
        cbam_kernel,
        out_shape=jax.ShapeDtypeStruct((N, C, HW), x.dtype),
        grid_spec=pltpu.PrefetchScalarGridSpec(
            num_scalar_prefetch=0,
            grid=(N // nb,),
            in_specs=[
                pl.BlockSpec((nb, C, HW), lambda n: (n, 0, 0)),    # x
                pl.BlockSpec((C, Cr), lambda n: (0, 0)),           # MLP w1.T
                pl.BlockSpec((Cr, C), lambda n: (0, 0)),           # MLP w2.T
                pl.BlockSpec((HW, HW), lambda n: (0, 0)),          # folded conv (avg plane, bf16)
                pl.BlockSpec((HW, HW), lambda n: (0, 0)),          # folded conv (max plane, bf16)
                pl.BlockSpec(memory_space=pltpu.MemorySpace.SMEM), # conv bias scalar
            ],
            out_specs=pl.BlockSpec((nb, C, HW), lambda n: (n, 0, 0)),
        ),
        compiler_params=pltpu.CompilerParams(
            dimension_semantics=("parallel",)),
    )(x_flat, w1t, w2t, k_avg, k_max, bias)

    return out_flat.reshape(N, C, H, W)


# ---------------- parameter setup (glue, plain JAX / numpy) ----------------

def make_params(key, C, ratio=16):
    Cr = max(C // ratio, 1)
    k1, k2, k3, k4 = jax.random.split(key, 4)
    w1 = jax.random.normal(k1, (Cr, C), jnp.float32) * (1.0 / np.sqrt(C))
    w2 = jax.random.normal(k2, (C, Cr), jnp.float32) * (1.0 / np.sqrt(Cr))
    w_sa = jax.random.normal(k3, (1, 2, 7, 7), jnp.float32) * (1.0 / np.sqrt(2 * 49))
    b_sa = jax.random.normal(k4, (1,), jnp.float32) * 0.1
    return w1, w2, w_sa, b_sa


def conv_to_matrices(w_sa, H, W, dtype=jnp.bfloat16):
    """Fold the 7x7 conv (cross-correlation, padding 3) into two dense (HW, HW)
    operators, one per input plane (channel-avg, channel-max):

        conv_flat = avg_flat @ K_avg + max_flat @ K_max + bias

    K_c[(h_in, w_in), (h_out, w_out)] = w[c, h_in - h_out + 3, w_in - w_out + 3]
    (zero outside the 7x7 window / image).  Stored in bf16 to halve the HBM
    transfer; the in-kernel dots accumulate in f32.
    """
    w = np.asarray(w_sa)[0]                                                    # (2, 7, 7)
    Sp = np.stack([np.eye(H, k=3 - kh, dtype=np.float32) for kh in range(7)])  # (7, H, H)
    Tp = np.stack([np.eye(W, k=3 - kw, dtype=np.float32) for kw in range(7)])  # (7, W, W)
    K = np.einsum('cab,ahi,bwj->chwij', w, Sp, Tp)                             # (2, H, W, H, W)
    K = K.reshape(2, H * W, H * W)
    return jnp.asarray(K[0], dtype), jnp.asarray(K[1], dtype)


# ---------------- pure-JAX reference for validation ----------------

def reference(x, w1, w2, w_sa, b_sa):
    avg = jnp.mean(x, axis=(2, 3))                   # (N, C)
    mx = jnp.max(x, axis=(2, 3))                     # (N, C)

    def mlp(v):
        return jnp.maximum(v @ w1.T, 0.0) @ w2.T

    ca = jax.nn.sigmoid(mlp(avg) + mlp(mx))          # (N, C)
    out1 = x * ca[:, :, None, None]

    avg_c = jnp.mean(out1, axis=1, keepdims=True)
    max_c = jnp.max(out1, axis=1, keepdims=True)
    cat = jnp.concatenate([avg_c, max_c], axis=1)    # (N, 2, H, W)
    conv = jax.lax.conv_general_dilated(
        cat, w_sa, window_strides=(1, 1), padding=((3, 3), (3, 3)),
        dimension_numbers=('NCHW', 'OIHW', 'NCHW'))
    sa = jax.nn.sigmoid(conv + b_sa.reshape(1, 1, 1, 1))
    return out1 * sa


if __name__ == "__main__":
    key = jax.random.PRNGKey(0)
    kx, kp = jax.random.split(key)

    # channel must be >= ratio=16 (as in the PyTorch module: channel // 16 >= 1)
    N, C, H, W = 4, 32, 16, 16
    x = jax.random.normal(kx, (N, C, H, W), jnp.float32)

    w1, w2, w_sa, b_sa = make_params(kp, C)
    k_avg, k_max = conv_to_matrices(w_sa, H, W)      # 2 x (HW, HW) bf16
    bias = b_sa.reshape(1)                           # scalar bias, SMEM

    out = origin_cbam(x, w1, w2, k_avg, k_max, bias)
    out = jax.block_until_ready(out)

    ref = reference(x, w1, w2, w_sa, b_sa)
    np.testing.assert_allclose(np.asarray(out), np.asarray(ref),
                               rtol=2e-2, atol=2e-2)
    print("KERNEL_OK")
</pallas_src>

<mosaic_0001>
module attributes {stable_mosaic.version = 11 : i64} {
  func.func @cbam_kernel(%arg0: i32, %arg1: memref<4x32x256xf32, #tpu.memory_space<vmem>>, %arg2: memref<32x2xf32, #tpu.memory_space<vmem>>, %arg3: memref<2x32xf32, #tpu.memory_space<vmem>>, %arg4: memref<256x256xbf16, #tpu.memory_space<vmem>>, %arg5: memref<256x256xbf16, #tpu.memory_space<vmem>>, %arg6: memref<1xf32, #tpu.memory_space<smem>>, %arg7: memref<4x32x256xf32, #tpu.memory_space<vmem>>) attributes {dimension_semantics = [#tpu.dimension_semantics<parallel>], iteration_bounds = array<i64: 1>, scalar_prefetch = 0 : i64, scratch_operands = 0 : i64, tpu.core_type = #tpu.core_type<tc>, window_params = [{transform_indices = @transform_0, window_bounds = array<i64: 4, 32, 256>}, {pipeline_mode = #tpu.pipeline_mode<synchronous>, transform_indices = @transform_1, window_bounds = array<i64: 32, 2>}, {pipeline_mode = #tpu.pipeline_mode<synchronous>, transform_indices = @transform_2, window_bounds = array<i64: 2, 32>}, {pipeline_mode = #tpu.pipeline_mode<synchronous>, transform_indices = @transform_3, window_bounds = array<i64: 256, 256>}, {pipeline_mode = #tpu.pipeline_mode<synchronous>, transform_indices = @transform_4, window_bounds = array<i64: 256, 256>}, {transform_indices = @transform_5, window_bounds = array<i64: 1>}, {transform_indices = @transform_6, window_bounds = array<i64: 4, 32, 256>}]} {
    %c0 = arith.constant 0 : index
    %c0_0 = arith.constant 0 : index
    %c0_1 = arith.constant 0 : index
    %0 = vector.load %arg1[%c0, %c0_0, %c0_1] : memref<4x32x256xf32, #tpu.memory_space<vmem>>, vector<4x32x256xf32>
    %cst = arith.constant dense<0.000000e+00> : vector<4x32xf32>
    %1 = vector.multi_reduction <add>, %0, %cst [2] : vector<4x32x256xf32> to vector<4x32xf32>
    %cst_2 = arith.constant 2.560000e+02 : f32
    %2 = vector.broadcast %cst_2 : f32 to vector<4x32xf32>
    %3 = arith.divf %1, %2 : vector<4x32xf32>
    %cst_3 = arith.constant dense<0xFF800000> : vector<4x32xf32>
    %4 = vector.multi_reduction <maximumf>, %0, %cst_3 [2] : vector<4x32x256xf32> to vector<4x32xf32>
    %c0_4 = arith.constant 0 : index
    %c0_5 = arith.constant 0 : index
    %5 = vector.load %arg2[%c0_4, %c0_5] : memref<32x2xf32, #tpu.memory_space<vmem>>, vector<32x2xf32>
    %c0_6 = arith.constant 0 : index
    %c0_7 = arith.constant 0 : index
    %6 = vector.load %arg3[%c0_6, %c0_7] : memref<2x32xf32, #tpu.memory_space<vmem>>, vector<2x32xf32>
    %cst_8 = arith.constant dense<0.000000e+00> : vector<4x2xf32>
    %7 = tpu.matmul %3, %5, %cst_8 {dimension_numbers = #tpu.dot_dimension_numbers<[1], [0], [0], [1], [0, 0, 1, 1], [], []>} : vector<4x32xf32>, vector<32x2xf32>, vector<4x2xf32> -> vector<4x2xf32>
    %cst_9 = arith.constant 0.000000e+00 : f32
    %8 = vector.broadcast %cst_9 : f32 to vector<4x2xf32>
    %9 = arith.maximumf %7, %8 : vector<4x2xf32>
    %cst_10 = arith.constant dense<0.000000e+00> : vector<4x2xf32>
    %10 = tpu.matmul %4, %5, %cst_10 {dimension_numbers = #tpu.dot_dimension_numbers<[1], [0], [0], [1], [0, 0, 1, 1], [], []>} : vector<4x32xf32>, vector<32x2xf32>, vector<4x2xf32> -> vector<4x2xf32>
    %cst_11 = arith.constant 0.000000e+00 : f32
    %11 = vector.broadcast %cst_11 : f32 to vector<4x2xf32>
    %12 = arith.maximumf %10, %11 : vector<4x2xf32>
    %cst_12 = arith.constant dense<0.000000e+00> : vector<4x32xf32>
    %13 = tpu.matmul %9, %6, %cst_12 {dimension_numbers = #tpu.dot_dimension_numbers<[1], [0], [0], [1], [0, 0, 1, 1], [], []>} : vector<4x2xf32>, vector<2x32xf32>, vector<4x32xf32> -> vector<4x32xf32>
    %cst_13 = arith.constant dense<0.000000e+00> : vector<4x32xf32>
    %14 = tpu.matmul %12, %6, %cst_13 {dimension_numbers = #tpu.dot_dimension_numbers<[1], [0], [0], [1], [0, 0, 1, 1], [], []>} : vector<4x2xf32>, vector<2x32xf32>, vector<4x32xf32> -> vector<4x32xf32>
    %15 = arith.addf %13, %14 : vector<4x32xf32>
    %16 = arith.negf %15 : vector<4x32xf32>
    %17 = math.exp %16 : vector<4x32xf32>
    %cst_14 = arith.constant 1.000000e+00 : f32
    %18 = vector.broadcast %cst_14 : f32 to vector<4x32xf32>
    %19 = arith.addf %18, %17 : vector<4x32xf32>
    %20 = arith.divf %18, %19 : vector<4x32xf32>
    %21 = vector.shape_cast %20 : vector<4x32xf32> to vector<4x32x1xf32>
    %22 = vector.broadcast %21 : vector<4x32x1xf32> to vector<4x32x256xf32>
    %23 = arith.mulf %0, %22 : vector<4x32x256xf32>
    %cst_15 = arith.constant dense<0.000000e+00> : vector<4x256xf32>
    %24 = vector.multi_reduction <add>, %23, %cst_15 [1] : vector<4x32x256xf32> to vector<4x256xf32>
    %cst_16 = arith.constant 3.200000e+01 : f32
    %25 = vector.broadcast %cst_16 : f32 to vector<4x256xf32>
    %26 = arith.divf %24, %25 : vector<4x256xf32>
    %27 = arith.truncf %26 : vector<4x256xf32> to vector<4x256xbf16>
    %cst_17 = arith.constant dense<0xFF800000> : vector<4x256xf32>
    %28 = vector.multi_reduction <maximumf>, %23, %cst_17 [1] : vector<4x32x256xf32> to vector<4x256xf32>
    %29 = arith.truncf %28 : vector<4x256xf32> to vector<4x256xbf16>
    %c0_18 = arith.constant 0 : index
    %c0_19 = arith.constant 0 : index
    %30 = vector.load %arg4[%c0_18, %c0_19] : memref<256x256xbf16, #tpu.memory_space<vmem>>, vector<256x256xbf16>
    %cst_20 = arith.constant dense<0.000000e+00> : vector<4x256xf32>
    %31 = tpu.matmul %27, %30, %cst_20 {dimension_numbers = #tpu.dot_dimension_numbers<[1], [0], [0], [1], [0, 0, 1, 1], [], []>} : vector<4x256xbf16>, vector<256x256xbf16>, vector<4x256xf32> -> vector<4x256xf32>
    %c0_21 = arith.constant 0 : index
    %c0_22 = arith.constant 0 : index
    %32 = vector.load %arg5[%c0_21, %c0_22] : memref<256x256xbf16, #tpu.memory_space<vmem>>, vector<256x256xbf16>
    %cst_23 = arith.constant dense<0.000000e+00> : vector<4x256xf32>
    %33 = tpu.matmul %29, %32, %cst_23 {dimension_numbers = #tpu.dot_dimension_numbers<[1], [0], [0], [1], [0, 0, 1, 1], [], []>} : vector<4x256xbf16>, vector<256x256xbf16>, vector<4x256xf32> -> vector<4x256xf32>
    %34 = arith.addf %31, %33 : vector<4x256xf32>
    %c0_24 = arith.constant 0 : index
    %35 = memref.load %arg6[%c0_24] : memref<1xf32, #tpu.memory_space<smem>>
    %36 = vector.broadcast %35 : f32 to vector<4x256xf32>
    %37 = arith.addf %34, %36 : vector<4x256xf32>
    %38 = arith.negf %37 : vector<4x256xf32>
    %39 = math.exp %38 : vector<4x256xf32>
    %cst_25 = arith.constant 1.000000e+00 : f32
    %40 = vector.broadcast %cst_25 : f32 to vector<4x256xf32>
    %41 = arith.addf %40, %39 : vector<4x256xf32>
    %42 = arith.divf %40, %41 : vector<4x256xf32>
    %43 = vector.shape_cast %42 : vector<4x256xf32> to vector<4x1x256xf32>
    %44 = vector.broadcast %43 : vector<4x1x256xf32> to vector<4x32x256xf32>
    %45 = arith.mulf %23, %44 : vector<4x32x256xf32>
    %c0_26 = arith.constant 0 : index
    %c0_27 = arith.constant 0 : index
    %c0_28 = arith.constant 0 : index
    %46 = vector.load %arg7[%c0_26, %c0_27, %c0_28] : memref<4x32x256xf32, #tpu.memory_space<vmem>>, vector<4x32x256xf32>
    tpu.vector_store %arg7[%c0_26, %c0_27, %c0_28], %45 {strides = array<i32>} : memref<4x32x256xf32, #tpu.memory_space<vmem>>, vector<4x32x256xf32>,
    return
  }
  func.func @transform_0(%arg0: i32) -> (i32, i32, i32) {
    %c0_i32 = arith.constant 0 : i32
    %c0_i32_0 = arith.constant 0 : i32
    %c0_i32_1 = arith.constant 0 : i32
    return %arg0, %c0_i32, %c0_i32_0 : i32, i32, i32
  }
  func.func @transform_1(%arg0: i32) -> (i32, i32) {
    %c0_i32 = arith.constant 0 : i32
    %c0_i32_0 = arith.constant 0 : i32
    %c0_i32_1 = arith.constant 0 : i32
    return %c0_i32, %c0_i32_0 : i32, i32
  }
  func.func @transform_2(%arg0: i32) -> (i32, i32) {
    %c0_i32 = arith.constant 0 : i32
    %c0_i32_0 = arith.constant 0 : i32
    %c0_i32_1 = arith.constant 0 : i32
    return %c0_i32, %c0_i32_0 : i32, i32
  }
  func.func @transform_3(%arg0: i32) -> (i32, i32) {
    %c0_i32 = arith.constant 0 : i32
    %c0_i32_0 = arith.constant 0 : i32
    %c0_i32_1 = arith.constant 0 : i32
    return %c0_i32, %c0_i32_0 : i32, i32
  }
  func.func @transform_4(%arg0: i32) -> (i32, i32) {
    %c0_i32 = arith.constant 0 : i32
    %c0_i32_0 = arith.constant 0 : i32
    %c0_i32_1 = arith.constant 0 : i32
    return %c0_i32, %c0_i32_0 : i32, i32
  }
  func.func @transform_5(%arg0: i32) -> i32 {
    %c0_i32 = arith.constant 0 : i32
    %c0_i32_0 = arith.constant 0 : i32
    return %c0_i32 : i32
  }
  func.func @transform_6(%arg0: i32) -> (i32, i32, i32) {
    %c0_i32 = arith.constant 0 : i32
    %c0_i32_0 = arith.constant 0 : i32
    %c0_i32_1 = arith.constant 0 : i32
    return %arg0, %c0_i32, %c0_i32_0 : i32, i32, i32
  }
}

</mosaic_0001>

<bundles_post_ra>
// kernel: tpu_custom_call.1
= control target key start
LH: loop header
LB: loop body
LE: loop exit
PB: predicated region body
PF: predicated region fallthrough
CT: control target
= control target key end

     0   :  { %12 = vsyncpa [#allocation4], 0  ;;  %s2564_s0 = inlined_call_operand.hbm [shape: f32[4,32,256], index: 0, kind: input, shape index: {}]   ;;  %s2565_s1 = inlined_call_operand.vmem [shape: f32[32,2], index: 1, kind: input, shape index: {}]   ;;  %s2566_s2 = inlined_call_operand.vmem [shape: f32[2,32], index: 2, kind: input, shape index: {}]   ;;  %s2567_s3 = inlined_call_operand.hbm [shape: bf16[256,256], index: 3, kind: input, shape index: {}]   ;;  %s2568_s4 = inlined_call_operand.hbm [shape: bf16[256,256], index: 4, kind: input, shape index: {}]   ;;  %s2569_s5 = inlined_call_operand.<no memory space> [shape: f32[1], index: 5, kind: input, shape index: {}]   ;;  %s2570_s6 = inlined_call_operand.hbm [shape: f32[4,32,256], index: 6, kind: output, shape index: {}]  }
   0x1   :  { %13 = vsyncpa [#allocation7], 0 }
   0x2   :  { %14 = vsyncpa [#allocation5], 0  ;;  %s2015_s21 = smov [#allocation6]  }
   0x3   :  { %s36_s22 = sshll.u32 %s2015_s21, 4  ;;  %s37_s22 = int_to_ptr.vmem [resolvable:$true] %s36_s22 }
   0x4   :  { %s1937_s23 = scalar_lea.vmem %s37_s22, 4096  ;;  %p1942_p1 = scmp.lt.s32.totalorder %s37_s22, %s37_s22 }
   0x5   :  { %p1938_p0 = scmp.ne.s32.totalorder %s37_s22, %s1937_s23  ;;  %p1943_p2 = scmp.lt.s32.totalorder %s1937_s23, %s1937_s23 }
   0x7   :  { %p1944_p3 = por %p1943_p2, %p1942_p1 }
   0x9   :  { %p1945_p4 = pnand %p1944_p3, %p1938_p0 }
   0xb   :  { %1948 = shalt.err (!%p1945_p4)
}
   0xc   :  { %s2016_s24 = smov 128   ;;  %s2017_s25 = smov 8  }
   0xd   :  { %42 = dma.hbm_to_vmem [thread:$0]  %s2567_s3, 4096, %s37_s22, [#allocation7], %s2016_s24, %s2016_s24, %s2017_s25  }
   0xe   :  { %s2018_s28 = smov [#allocation3]  }
   0xf   :  { %s20_s29 = sshll.u32 %s2018_s28, 4  ;;  %s21_s29 = int_to_ptr.vmem [resolvable:$true] %s20_s29 }
  0x10   :  { %s1957_s30 = scalar_lea.vmem %s21_s29, 4096  ;;  %p1962_p6 = scmp.lt.s32.totalorder %s21_s29, %s21_s29 }
  0x11   :  { %p1958_p5 = scmp.ne.s32.totalorder %s21_s29, %s1957_s30  ;;  %p1963_p7 = scmp.lt.s32.totalorder %s1957_s30, %s1957_s30 }
  0x13   :  { %p1964_p8 = por %p1963_p7, %p1962_p6 }
  0x15   :  { %p1965_p9 = pnand %p1964_p8, %p1958_p5 }
  0x17   :  { %1968 = shalt.err (!%p1965_p9)
}
  0x18   :  { %s2019_s7 = smov 256   ;;  %s2020_s8 = smov 16  }
  0x19   :  { %26 = dma.hbm_to_vmem [thread:$0]  %s2564_s0, 4096, %s21_s29, [#allocation4], %s2019_s7, %s2019_s7, %s2020_s8  }
  0x1a   :  { %s2021_s3 = smov [#allocation8]  }
  0x1b   :  { %s48_s11 = sshll.u32 %s2021_s3, 4  ;;  %s49_s11 = int_to_ptr.vmem [resolvable:$true] %s48_s11 }
  0x1c   :  { %s1977_s12 = scalar_lea.vmem %s49_s11, 4096  ;;  %p1982_p11 = scmp.lt.s32.totalorder %s49_s11, %s49_s11 }
  0x1d   :  { %p1978_p10 = scmp.ne.s32.totalorder %s49_s11, %s1977_s12  ;;  %p1983_p12 = scmp.lt.s32.totalorder %s1977_s12, %s1977_s12 }
  0x1f   :  { %p1984_p13 = por %p1983_p12, %p1982_p11 }
  0x21   :  { %p1985_p0 = pnand %p1984_p13, %p1978_p10 }
  0x23   :  { %1988 = shalt.err (!%p1985_p0)
}
  0x24   :  { %54 = dma.hbm_to_vmem [thread:$0]  %s2568_s4, 4096, %s49_s11, [#allocation7], %s2016_s24, %s2016_s24, %s2017_s25  }
  0x25   :  { %2009 = dma.done.wait [#allocation4], 4096  }
  0x26   :  { %2010 = vsyncadd [#allocation4], 4294963200 }
  0x27   :  { %2011 = dma.done.wait [#allocation7], 8192  }
  0x28   :  { %2012 = vsyncadd [#allocation7], 4294959104  ;;  %v2073_v0 = vld [vmem:[#allocation3 + $0x40] sm:$0xff]  ;;  %v75_v1 = vld [vmem:[#allocation3 + $0x48] sm:$0xff]  ;;  %v2022_v62 = vmov 0.0   ;;  %vm2023_vm0 = vmmov 0  }
  0x29   :  { %v2075_v2 = vld [vmem:[#allocation3] sm:$0xff]  ;;  %v110_v3 = vadd.f32 %v75_v1, %v2073_v0  ;;  %v2078_v4 = vld [vmem:[#allocation3 + $0x8] sm:$0xff]  ;;  %v2080_v5 = vld [vmem:[#allocation3 + $0x50] sm:$0xff]  ;;  %v175_v42 = vmax.f32 %v2073_v0, %v75_v1  ;;  %1768 = vmatprep.subr.mxu0 %v2022_v62  ;;  %1779 = vmatprep.subr.mxu1 %v2022_v62  ;;  %vm243_vm1 = vcmask 130112   ;;  %vm250_vm2 = vcmask 195712  }
  0x2a   :  { %v2082_v6 = vld [vmem:[#allocation3 + $0x58] sm:$0xff]  ;;  %v98_v7 = vadd.f32 %v2078_v4, %v2075_v2  ;;  %v2086_v8 = vld [vmem:[#allocation3 + $0x10] sm:$0xff]  ;;  %v2094_v12 = vld [vmem:[#allocation3 + $0x60] sm:$0xff]  ;;  %v163_v38 = vmax.f32 %v2075_v2, %v2078_v4  ;;  %1776 = vmatprep.mubr.msk.f32.mxu0 %vm2023_vm0, %v2022_v62  ;;  %1787 = vmatprep.mubr.msk.f32.mxu1 %vm2023_vm0, %v2022_v62  ;;  %vm257_vm3 = vcmask 261312   ;;  %vm316_vm4 = vcmask 1041409  }
  0x2b   :  { %v2088_v9 = vld [vmem:[#allocation3 + $0x18] sm:$0xff]  ;;  %111 = vadd.xlane.f32.xlu1 %v110_v3  ;;  %v113_v10 = vadd.f32 %v2082_v6, %v2080_v5  ;;  %v79_v13 = vld [vmem:[#allocation3 + $0x68] sm:$0xff]  ;;  %v2096_v14 = vld [vmem:[#allocation3 + $0x20] sm:$0xff]  ;;  %v178_v45 = vmax.f32 %v2080_v5, %v2082_v6  ;;  %vm318_vm5 = vcmask 1042434   ;;  %vm320_vm6 = vcmask 1043459  }
  0x2c   :  { %99 = vadd.xlane.f32.xlu0 %v98_v7  ;;  %v101_v11 = vadd.f32 %v2088_v9, %v2086_v8  ;;  %v2098_v15 = vld [vmem:[#allocation3 + $0x28] sm:$0xff]  ;;  %v116_v16 = vadd.f32 %v79_v13, %v2094_v12  ;;  %v2103_v18 = vld [vmem:[#allocation3 + $0x90] sm:$0xff]  ;;  %v2105_v19 = vld [vmem:[#allocation3 + $0x98] sm:$0xff]  ;;  %v166_v43 = vmax.f32 %v2086_v8, %v2088_v9  ;;  %v181_v51 = vmax.f32 %v2094_v12, %v79_v13 }
  0x2d   :  { %v104_v17 = vadd.f32 %v2098_v15, %v2096_v14  ;;  %v2107_v20 = vld [vmem:[#allocation3 + $0x80] sm:$0xff]  ;;  %v2109_v21 = vld [vmem:[#allocation3 + $0x88] sm:$0xff]  ;;  %v80_v22 = vld [vmem:[#allocation3 + $0x70] sm:$0xff]  ;;  %v125_v24 = vadd.f32 %v2105_v19, %v2103_v18  ;;  %v169_v48 = vmax.f32 %v2096_v14, %v2098_v15  ;;  %v190_v55 = vmax.f32 %v2103_v18, %v2105_v19 }
  0x2e   :  { %v81_v23 = vld [vmem:[#allocation3 + $0x78] sm:$0xff]  ;;  %v72_v25 = vld [vmem:[#allocation3 + $0x30] sm:$0xff]  ;;  %v122_v27 = vadd.f32 %v2109_v21, %v2107_v20  ;;  %v2115_v28 = vld [vmem:[#allocation3 + $0xc0] sm:$0xff]  ;;  %v187_v50 = vmax.f32 %v2107_v20, %v2109_v21  ;;  %vm322_vm7 = vcmask 261120   ;;  %vm568_vm8 = vcmask 1041408  }
  0x2f   :  { %114 = vadd.xlane.f32.xlu1 %v113_v10  ;;  %v73_v26 = vld [vmem:[#allocation3 + $0x38] sm:$0xff]  ;;  %v2117_v29 = vld [vmem:[#allocation3 + $0xc8] sm:$0xff]  ;;  %v119_v30 = vadd.f32 %v81_v23, %v80_v22  ;;  %v2119_v31 = vld [vmem:[#allocation3 + $0xa0] sm:$0xff]  ;;  %v184_v56 = vmax.f32 %v80_v22, %v81_v23  ;;  %vm564_vm9 = vcmask 15360  }
  0x30   :  { %102 = vadd.xlane.f32.xlu0 %v101_v11  ;;  %v2121_v32 = vld [vmem:[#allocation3 + $0xa8] sm:$0xff]  ;;  %v107_v33 = vadd.f32 %v73_v26, %v72_v25  ;;  %v134_v34 = vadd.f32 %v2117_v29, %v2115_v28  ;;  %v2125_v35 = vld [vmem:[#allocation3 + $0xd0] sm:$0xff]  ;;  %v2127_v36 = vld [vmem:[#allocation3 + $0xd8] sm:$0xff]  ;;  %v172_v57 = vmax.f32 %v72_v25, %v73_v26  ;;  %v199_v58 = vmax.f32 %v2115_v28, %v2117_v29 }
  0x31   :  { %v128_v37 = vadd.f32 %v2121_v32, %v2119_v31  ;;  %v137_v39 = vadd.f32 %v2127_v36, %v2125_v35  ;;  %v2135_v40 = vld [vmem:[#allocation3 + $0xb0] sm:$0xff]  ;;  %v89_v41 = vld [vmem:[#allocation3 + $0xb8] sm:$0xff]  ;;  %v94_v46 = vld [vmem:[#allocation3 + $0xe0] sm:$0xff]  ;;  %v193_v59 = vmax.f32 %v2119_v31, %v2121_v32  ;;  %v202_v61 = vmax.f32 %v2125_v35, %v2127_v36 }
  0x32   :  { %v131_v44 = vadd.f32 %v89_v41, %v2135_v40  ;;  %v95_v47 = vld [vmem:[#allocation3 + $0xe8] sm:$0xff]  ;;  %v2148_v52 = vld [vmem:[#allocation3 + $0xf0] sm:$0xff]  ;;  %v97_v53 = vld [vmem:[#allocation3 + $0xf8] sm:$0xff]  ;;  %v196_v60 = vmax.f32 %v2135_v40, %v89_v41 }
  0x33   :  { %117 = vadd.xlane.f32.xlu1 %v116_v16  ;;  %v140_v49 = vadd.f32 %v95_v47, %v94_v46  ;;  %v143_v54 = vadd.f32 %v97_v53, %v2148_v52  ;;  %v214_v63 = vld [vmem:[%s2565_s1 + $0x18] sm:$0xff]  ;;  %v213_v1 = vld [vmem:[%s2565_s1 + $0x10] sm:$0xff]  ;;  %v208_v3 = vmax.f32 %v2148_v52, %v97_v53  ;;  %v205_v7 = vmax.f32 %v94_v46, %v95_v47  ;;  %v212_v10 = vld [vmem:[%s2565_s1 + $0x8] sm:$0xff] }
  0x34   :  { %105 = vadd.xlane.f32.xlu0 %v104_v17  ;;  %1769 = vmatpush3.msra.mxu0 %v214_v63  ;;  %v211_v11 = vld [vmem:[%s2565_s1] sm:$0xff] }
  0x35   :  { %1770 = vmatprep.subr.mxu0 %v2022_v62  ;;  %1780 = vmatpush3.msra.mxu1 %v214_v63 }
  0x36   :  { %1771 = vmatpush3.msra.mxu0 %v213_v1  ;;  %1781 = vmatprep.subr.mxu1 %v2022_v62 }
  0x37   :  { %126 = vadd.xlane.f32.xlu1 %v125_v24  ;;  %1772 = vmatprep.subr.mxu0 %v2022_v62 }
  0x38   :  { %123 = vadd.xlane.f32.xlu0 %v122_v27  ;;  %1773 = vmatpush3.msra.mxu0 %v212_v10 }
  0x39   :  { %1774 = vmatprep.subr.mxu0 %v2022_v62  ;;  %1782 = vmatpush3.msra.mxu1 %v213_v1 }
  0x3a   :  { %1775 = vmatpush3.msra.mxu0 %v211_v11  ;;  %1783 = vmatprep.subr.mxu1 %v2022_v62 }
  0x3b   :  { %120 = vadd.xlane.f32.xlu1 %v119_v30  ;;  %1784 = vmatpush3.msra.mxu1 %v212_v10 }
  0x3c   :  { %108 = vadd.xlane.f32.xlu0 %v107_v33  ;;  %1790 = vmatprep.subr.mxu0 %v2022_v62 }
  0x3d   :  { %1785 = vmatprep.subr.mxu1 %v2022_v62 }
  0x3e   :  { %1786 = vmatpush3.msra.mxu1 %v211_v11 }
  0x3f   :  { %135 = vadd.xlane.f32.xlu1 %v134_v34  ;;  %1795 = vmatprep.subr.mxu1 %v2022_v62 }
  0x40   :  { %129 = vadd.xlane.f32.xlu0 %v128_v37  ;;  %v232_v37 = vlaneseq }
  0x42   :  { %v233_v41 = vand.u32 127, %v232_v37 }
  0x43   :  { %164 = vmax.xlane.f32.xlu1 %v163_v38 }
  0x44   :  { %138 = vadd.xlane.f32.xlu0 %v137_v39  ;;  %v245_v46 = vadd.s32 4294967280, %v233_v41  ;;  %v252_v47 = vadd.s32 4294967272, %v233_v41 }
  0x47   :  { %176 = vmax.xlane.f32.xlu1 %v175_v42 }
  0x48   :  { %167 = vmax.xlane.f32.xlu0 %v166_v43  ;;  %v2191_v43 = vshrl.u32 %v232_v37, 7 }
  0x4b   :  { %132 = vadd.xlane.f32.xlu1 %v131_v44 }
  0x4c   :  { %179 = vmax.xlane.f32.xlu0 %v178_v45  ;;  %v238_v45 = vadd.s32 4294967288, %v233_v41 }
  0x4e   :  { %v2201_v53 = vsub.s32 %v238_v45, %v2191_v43 }
  0x4f   :  { %170 = vmax.xlane.f32.xlu1 %v169_v48 }
  0x50   :  { %141 = vadd.xlane.f32.xlu0 %v140_v49  ;;  %v2196_v49 = vsub.s32 %v233_v41, %v2191_v43 }
  0x53   :  { %188 = vmax.xlane.f32.xlu1 %v187_v50 }
  0x54   :  { %182 = vmax.xlane.f32.xlu0 %v181_v51 }
  0x57   :  { %144 = vadd.xlane.f32.xlu1 %v143_v54 }
  0x58   :  { %191 = vmax.xlane.f32.xlu0 %v190_v55 }
  0x5b   :  { %185 = vmax.xlane.f32.xlu1 %v184_v56  ;;  %v2204_v56 = vsub.s32 %v245_v46, %v2191_v43 }
  0x5c   :  { %173 = vmax.xlane.f32.xlu0 %v172_v57 }
  0x5f   :  { %200 = vmax.xlane.f32.xlu1 %v199_v58 }
  0x60   :  { %194 = vmax.xlane.f32.xlu0 %v193_v59 }
  0x63   :  { %197 = vmax.xlane.f32.xlu1 %v196_v60 }
  0x64   :  { %203 = vmax.xlane.f32.xlu0 %v202_v61  ;;  %v2207_v61 = vsub.s32 %v252_v47, %v2191_v43 }
  0x67   :  { %209 = vmax.xlane.f32.xlu1 %v208_v3 }
  0x68   :  { %206 = vmax.xlane.f32.xlu0 %v205_v7 }
  0xb4   :  { %v112_v13 = vpop.xlane.xlu1 %111 }
  0xb5   :  { %v100_v16 = vpop.xlane.xlu0 %99  ;;  %v151_v51 = vmul.f32 0.00390625, %v112_v13 }
  0xb6   :  { %v147_v3 = vmul.f32 0.00390625, %v100_v16 }
  0xb7   :  { %v262_v13 = vrot.slane %v151_v51, %v2196_v49 }
  0xb8   :  { %v115_v17 = vpop.xlane.xlu1 %114  ;;  %v237_v41 = vrot.slane %v147_v3, %v2196_v49 }
  0xb9   :  { %v103_v22 = vpop.xlane.xlu0 %102  ;;  %v152_v54 = vmul.f32 0.00390625, %v115_v17 }
  0xba   :  { %v148_v55 = vmul.f32 0.00390625, %v103_v22 }
  0xbb   :  { %v266_v17 = vrot.slane %v152_v54, %v2201_v53 }
  0xbc   :  { %v118_v23 = vpop.xlane.xlu1 %117 }
  0xbd   :  { %v106_v24 = vpop.xlane.xlu0 %105  ;;  %v153_v57 = vmul.f32 0.00390625, %v118_v23  ;;  %v242_v23 = vrot.slane %v148_v55, %v2201_v53  ;;  %v267_v51 = vsel %vm243_vm1, %v266_v17, %v262_v13 }
  0xbe   :  { %v149_v58 = vmul.f32 0.00390625, %v106_v24 }
  0xbf   :  { %v271_v24 = vrot.slane %v153_v57, %v2204_v56  ;;  %v244_v54 = vsel %vm243_vm1, %v242_v23, %v237_v41 }
  0xc0   :  { %v127_v25 = vpop.xlane.xlu1 %126 }
  0xc1   :  { %v124_v26 = vpop.xlane.xlu0 %123  ;;  %v156_v59 = vmul.f32 0.00390625, %v127_v25  ;;  %v249_v25 = vrot.slane %v149_v58, %v2204_v56  ;;  %v272_v55 = vsel %vm250_vm2, %v271_v24, %v267_v51 }
  0xc2   :  { %v155_v60 = vmul.f32 0.00390625, %v124_v26 }
  0xc3   :  { %v251_v58 = vsel %vm250_vm2, %v249_v25, %v244_v54 }
  0xc4   :  { %v121_v27 = vpop.xlane.xlu1 %120  ;;  %v281_v16 = vrot.slane %v155_v60, %v2196_v49 }
  0xc5   :  { %v109_v30 = vpop.xlane.xlu0 %108  ;;  %v154_v63 = vmul.f32 0.00390625, %v121_v27  ;;  %v285_v27 = vrot.slane %v156_v59, %v2201_v53 }
  0xc6   :  { %v150_v7 = vmul.f32 0.00390625, %v109_v30 }
  0xc7   :  { %v276_v30 = vrot.slane %v154_v63, %v2207_v61  ;;  %v286_v59 = vsel %vm243_vm1, %v285_v27, %v281_v16 }
  0xc8   :  { %v136_v33 = vpop.xlane.xlu1 %135  ;;  %v256_v45 = vrot.slane %v150_v7, %v2207_v61 }
  0xc9   :  { %v130_v34 = vpop.xlane.xlu0 %129  ;;  %v159_v46 = vmul.f32 0.00390625, %v136_v33  ;;  %v277_v33 = vsel %vm257_vm3, %v276_v30, %v272_v55 }
  0xca   :  { %v157_v10 = vmul.f32 0.00390625, %v130_v34  ;;  %v258_v3 = vsel %vm257_vm3, %v256_v45, %v251_v58 }
  0xcb   :  { %v300_v7 = vrot.slane %v159_v46, %v2196_v49 }
  0xcc   :  { %v2187_v38 = vpop.xlane.xlu1 %164  ;;  %v290_v47 = vrot.slane %v157_v10, %v2204_v56 }
  0xcd   :  { %v139_v39 = vpop.xlane.xlu0 %138 }
  0xce   :  { %v160_v26 = vmul.f32 0.00390625, %v139_v39  ;;  %v291_v10 = vsel %vm250_vm2, %v290_v47, %v286_v59  ;;  %v415_v59 = vrot.slane %v2187_v38, %v2196_v49 }
  0xd0   :  { %v2189_v42 = vpop.xlane.xlu1 %176  ;;  %v304_v57 = vrot.slane %v160_v26, %v2201_v53  ;;  %v317_v26 = vsel %vm316_vm4, %v277_v33, %v258_v3 }
  0xd1   :  { %v2193_v44 = vpop.xlane.xlu0 %167 }
  0xd2   :  { %v419_v47 = vrot.slane %v2193_v44, %v2201_v53 }
  0xd4   :  { %v133_v48 = vpop.xlane.xlu1 %132 }
  0xd5   :  { %v2198_v50 = vpop.xlane.xlu0 %179  ;;  %v158_v22 = vmul.f32 0.00390625, %v133_v48 }
  0xd6   :  { %v438_v46 = vrot.slane %v2198_v50, %v2201_v53 }
  0xd7   :  { %v295_v39 = vrot.slane %v158_v22, %v2207_v61  ;;  %v305_v22 = vsel %vm243_vm1, %v304_v57, %v300_v7 }
  0xd8   :  { %v2209_v1 = vpop.xlane.xlu1 %170 }
  0xd9   :  { %v142_v11 = vpop.xlane.xlu0 %141  ;;  %v296_v17 = vsel %vm257_vm3, %v295_v39, %v291_v10  ;;  %v434_v39 = vrot.slane %v2189_v42, %v2196_v49  ;;  %v424_v54 = vrot.slane %v2209_v1, %v2204_v56  ;;  %v420_v1 = vsel %vm243_vm1, %v419_v47, %v415_v59  ;;  %v1820_v59 = vld [vmem:[#allocation6 + $0x60] ss:$8 sps:$4 sm:$0xff]  }
  0xda   :  { %v161_v34 = vmul.f32 0.00390625, %v142_v11  ;;  %v319_v30 = vsel %vm318_vm5, %v296_v17, %v317_v26 }
  0xdb   :  { %v425_v7 = vsel %vm250_vm2, %v424_v54, %v420_v1  ;;  %v1814_v54 = vld [vmem:[#allocation6 + $0x70] ss:$8 sps:$4 sm:$0xff]  }
  0xdc   :  { %v189_v37 = vpop.xlane.xlu1 %188  ;;  %v309_v60 = vrot.slane %v161_v34, %v2204_v56 }
  0xdd   :  { %v183_v48 = vpop.xlane.xlu0 %182  ;;  %v453_v42 = vrot.slane %v189_v37, %v2196_v49 }
  0xde   :  { %v310_v24 = vsel %vm250_vm2, %v309_v60, %v305_v22  ;;  %v443_v51 = vrot.slane %v183_v48, %v2204_v56  ;;  %v439_v48 = vsel %vm243_vm1, %v438_v46, %v434_v39  ;;  %v1813_v39 = vld [vmem:[#allocation8 + $0x74] ss:$8 sps:$4 sm:$0xff]  }
  0xe0   :  { %v145_v63 = vpop.xlane.xlu1 %144 }
  0xe1   :  { %v162_v11 = vmul.f32 0.00390625, %v145_v63  ;;  %v192_v13 = vpop.xlane.xlu0 %191  ;;  %v444_v63 = vsel %vm250_vm2, %v443_v51, %v439_v48  ;;  %v1811_v51 = vld [vmem:[#allocation8 + $0x70] ss:$8 sps:$4 sm:$0xff]  }
  0xe2   :  { %v457_v55 = vrot.slane %v192_v13, %v2201_v53 }
  0xe3   :  { %v314_v23 = vrot.slane %v162_v11, %v2207_v61 }
  0xe4   :  { %v186_v25 = vpop.xlane.xlu1 %185  ;;  %v458_v38 = vsel %vm243_vm1, %v457_v55, %v453_v42  ;;  %v1819_v55 = vld [vmem:[#allocation8 + $0x64] ss:$8 sps:$4 sm:$0xff]  }
  0xe5   :  { %v174_v27 = vpop.xlane.xlu0 %173  ;;  %v315_v16 = vsel %vm257_vm3, %v314_v23, %v310_v24  ;;  %v448_v57 = vrot.slane %v186_v25, %v2207_v61 }
  0xe6   :  { %v321_v34 = vsel %vm320_vm6, %v315_v16, %v319_v30  ;;  %v429_v50 = vrot.slane %v174_v27, %v2207_v61 }
  0xe7   :  { %1777 = vmatmul.mubr.msk.f32.vlgmr.msra.gmra.mxu0 %vm322_vm7, %v321_v34  ;;  %v449_v10 = vsel %vm257_vm3, %v448_v57, %v444_v63  ;;  %v1822_v57 = vld [vmem:[#allocation6 + $0x64] ss:$8 sps:$4 sm:$0xff]  }
  0xe8   :  { %v201_v41 = vpop.xlane.xlu1 %200  ;;  %1792 = vmatprep.mubr.msk.f32.mxu0 %vm2023_vm0, %v2022_v62  ;;  %v430_v13 = vsel %vm257_vm3, %v429_v50, %v425_v7  ;;  %v1823_v7 = vld [vmem:[#allocation8 + $0x50] ss:$8 sps:$4 sm:$0xff]  }
  0xe9   :  { %v195_v45 = vpop.xlane.xlu0 %194  ;;  %v472_v17 = vrot.slane %v201_v41, %v2196_v49  ;;  %v488_v26 = vsel %vm316_vm4, %v449_v10, %v430_v13  ;;  %v1826_v10 = vld [vmem:[#allocation6 + $0x50] ss:$8 sps:$4 sm:$0xff]   ;;  %v1829_v13 = vld [vmem:[#allocation8 + $0x40] ss:$8 sps:$4 sm:$0xff]  }
  0xea   :  { %v462_v44 = vrot.slane %v195_v45, %v2204_v56 }
  0xec   :  { %v198_v58 = vpop.xlane.xlu1 %197  ;;  %v463_v37 = vsel %vm250_vm2, %v462_v44, %v458_v38  ;;  %v1828_v38 = vld [vmem:[#allocation6 + $0x54] ss:$8 sps:$4 sm:$0xff]  }
  0xed   :  { %v204_v33 = vpop.xlane.xlu0 %203  ;;  %v467_v60 = vrot.slane %v198_v58, %v2207_v61  ;;  %v1817_v58 = vld [vmem:[#allocation8 + $0x60] ss:$8 sps:$4 sm:$0xff]  }
  0xee   :  { %v476_v3 = vrot.slane %v204_v33, %v2201_v53 }
  0xef   :  { %v468_v24 = vsel %vm257_vm3, %v467_v60, %v463_v37  ;;  %v1834_v37 = vld [vmem:[#allocation6 + $0x44] ss:$8 sps:$4 sm:$0xff]  }
  0xf0   :  { %v210_v11 = vpop.xlane.xlu1 %209  ;;  %v477_v25 = vsel %vm243_vm1, %v476_v3, %v472_v17  ;;  %v489_v30 = vsel %vm318_vm5, %v468_v24, %v488_v26  ;;  %v1825_v3 = vld [vmem:[#allocation8 + $0x54] ss:$8 sps:$4 sm:$0xff]   ;;  %v1832_v17 = vld [vmem:[#allocation6 + $0x40] ss:$8 sps:$4 sm:$0xff]   ;;  %v1835_v24 = vld [vmem:[#allocation8 + $0x30] ss:$8 sps:$4 sm:$0xff]  }
  0xf1   :  { %v207_v22 = vpop.xlane.xlu0 %206  ;;  %v486_v23 = vrot.slane %v210_v11, %v2207_v61  ;;  %v1831_v11 = vld [vmem:[#allocation8 + $0x44] ss:$8 sps:$4 sm:$0xff]   ;;  %v1838_v26 = vld [vmem:[#allocation6 + $0x30] ss:$8 sps:$4 sm:$0xff]  }
  0xf2   :  { %v481_v53 = vrot.slane %v207_v22, %v2204_v56  ;;  %v215_v56 = vld [vmem:[%s2566_s2] sm:$0x3]  ;;  %v2288_v22 = vsub.s32 0, %v2191_v43 }
  0xf3   :  { %1791 = vmatpush3.msk.msra.mxu0 %vm568_vm8, %v215_v56 }
  0xf4   :  { %v482_v27 = vsel %vm250_vm2, %v481_v53, %v477_v25  ;;  %1248 = vmatprep.subr.bf16.mxu0 %v1813_v39  ;;  %v1840_v53 = vld [vmem:[#allocation6 + $0x34] ss:$8 sps:$4 sm:$0xff]   ;;  %v1850_v39 = vld [vmem:[#allocation6 + $0x10] ss:$8 sps:$4 sm:$0xff]  }
  0xf5   :  { %v487_v16 = vsel %vm257_vm3, %v486_v23, %v482_v27  ;;  %v1837_v23 = vld [vmem:[#allocation8 + $0x34] ss:$8 sps:$4 sm:$0xff]  }
  0xf6   :  { %v490_v49 = vsel %vm320_vm6, %v487_v16, %v489_v30  ;;  %v2292_v16 = vsub.s32 1, %v2191_v43  ;;  %v761_v30 = vsub.s32 2, %v2191_v43 }
  0xf7   :  { %1788 = vmatmul.mubr.msk.f32.vlgmr.msra.gmra.mxu1 %vm322_vm7, %v490_v49  ;;  %v1843_v49 = vld [vmem:[#allocation8 + $0x24] ss:$8 sps:$4 sm:$0xff]  }
  0xf8   :  { %1797 = vmatprep.mubr.msk.f32.mxu1 %vm2023_vm0, %v2022_v62  ;;  %1796 = vmatpush3.msk.msra.mxu1 %vm568_vm8, %v215_v56  ;;  %v1816_v62 = vld [vmem:[#allocation6 + $0x74] ss:$8 sps:$4 sm:$0xff]   ;;  %v1841_v56 = vld [vmem:[#allocation8 + $0x20] ss:$8 sps:$4 sm:$0xff]  }
  0xf9   :  { %1475 = vmatprep.subr.bf16.mxu1 %v1816_v62  ;;  %v1855_v62 = vld [vmem:[#allocation8 + $0x4] ss:$8 sps:$4 sm:$0xff]  }
 0x1a7   :  { %v391_v61 = vpop.f32.mrf.mxu0 }
 0x1a8   :  { %v395_v34 = vmax.f32 %v391_v61, 0.0  ;;  %v1846_v61 = vld [vmem:[#allocation6 + $0x24] ss:$8 sps:$4 sm:$0xff]  }
 0x1a9   :  { %v1778_v41 = vpop.f32.mrf.mxu0 }
 0x1aa   :  { %1798 = vmatmul.mubr.msk.f32.vlgmr.msra.gmra.mxu1 %vm564_vm9, %v395_v34  ;;  %v1844_v34 = vld [vmem:[#allocation6 + $0x20] ss:$8 sps:$4 sm:$0xff]  }
 0x1ab   :  { %1476 = vmatpush1.bf16.msra.mxu1 %v1814_v54  ;;  %v780_v54 = vsub.s32 3, %v2191_v43 }
 0x1ac   :  { %1477 = vmatprep.subr.bf16.mxu1 %v1822_v57  ;;  %v1858_v57 = vld [vmem:[#allocation6 + $0x4] ss:$8 sps:$4 sm:$0xff]  }
 0x1af   :  { %1478 = vmatpush1.bf16.msra.mxu1 %v1820_v59 }
 0x1b0   :  { %1479 = vmatprep.subr.bf16.mxu1 %v1828_v38  ;;  %v1876_v38 = vld [vmem:[#allocation6 + $0xd4] ss:$8 sps:$4 sm:$0xff]  }
 0x1b3   :  { %1480 = vmatpush1.bf16.msra.mxu1 %v1826_v10  ;;  %v1874_v10 = vld [vmem:[#allocation6 + $0xd0] ss:$8 sps:$4 sm:$0xff]  }
 0x1b4   :  { %1481 = vmatprep.subr.bf16.mxu1 %v1834_v37  ;;  %v1880_v37 = vld [vmem:[#allocation6 + $0xc0] ss:$8 sps:$4 sm:$0xff]  }
 0x1b7   :  { %v559_v45 = vpop.f32.mrf.mxu1  ;;  %1482 = vmatpush1.bf16.msra.mxu1 %v1832_v17  ;;  %v1882_v17 = vld [vmem:[#allocation6 + $0xc4] ss:$8 sps:$4 sm:$0xff]  }
 0x1b8   :  { %v563_v46 = vmax.f32 %v559_v45, 0.0  ;;  %1483 = vmatprep.subr.bf16.mxu1 %v1840_v53  ;;  %v1888_v53 = vld [vmem:[#allocation6 + $0xb4] ss:$8 sps:$4 sm:$0xff]  }
 0x1b9   :  { %v1789_v47 = vpop.f32.mrf.mxu1 }
 0x1ba   :  { %1793 = vmatmul.mubr.msk.f32.vlgmr.msra.gmra.mxu0 %vm564_vm9, %v563_v46  ;;  %v1849_v46 = vld [vmem:[#allocation8 + $0x14] ss:$8 sps:$4 sm:$0xff]   ;;  %v1847_v47 = vld [vmem:[#allocation8 + $0x10] ss:$8 sps:$4 sm:$0xff]  }
 0x1bb   :  { %1249 = vmatpush1.bf16.msra.mxu0 %v1811_v51  ;;  %1484 = vmatpush1.bf16.msra.mxu1 %v1838_v26  ;;  %v1852_v51 = vld [vmem:[#allocation6 + $0x14] ss:$8 sps:$4 sm:$0xff]   ;;  %v1891_v26 = vld [vmem:[#allocation8 + $0xa4] ss:$8 sps:$4 sm:$0xff]  }
 0x1bc   :  { %1250 = vmatprep.subr.bf16.mxu0 %v1819_v55  ;;  %1485 = vmatprep.subr.bf16.mxu1 %v1846_v61  ;;  %v1853_v55 = vld [vmem:[#allocation8] ss:$8 sps:$4 sm:$0xff]   ;;  %v1895_v61 = vld [vmem:[#allocation8 + $0x90] ss:$8 sps:$4 sm:$0xff]  }
 0x1bf   :  { %1251 = vmatpush1.bf16.msra.mxu0 %v1817_v58  ;;  %1486 = vmatpush1.bf16.msra.mxu1 %v1844_v34  ;;  %v1856_v58 = vld [vmem:[#allocation6] ss:$8 sps:$4 sm:$0xff]   ;;  %v1898_v34 = vld [vmem:[#allocation6 + $0x90] ss:$8 sps:$4 sm:$0xff]  }
 0x1c0   :  { %1252 = vmatprep.subr.bf16.mxu0 %v1825_v3  ;;  %1487 = vmatprep.subr.bf16.mxu1 %v1852_v51  ;;  %v1873_v3 = vld [vmem:[#allocation8 + $0xd4] ss:$8 sps:$4 sm:$0xff]   ;;  %v1904_v51 = vld [vmem:[#allocation6 + $0x80] ss:$8 sps:$4 sm:$0xff]  }
 0x1c3   :  { %1253 = vmatpush1.bf16.msra.mxu0 %v1823_v7  ;;  %1488 = vmatpush1.bf16.msra.mxu1 %v1850_v39  ;;  %v1871_v7 = vld [vmem:[#allocation8 + $0xd0] ss:$8 sps:$4 sm:$0xff]  }
 0x1c4   :  { %1254 = vmatprep.subr.bf16.mxu0 %v1831_v11  ;;  %1489 = vmatprep.subr.bf16.mxu1 %v1858_v57  ;;  %v1879_v11 = vld [vmem:[#allocation8 + $0xc4] ss:$8 sps:$4 sm:$0xff]  }
 0x1c7   :  { %1255 = vmatpush1.bf16.msra.mxu0 %v1829_v13  ;;  %1490 = vmatpush1.bf16.msra.mxu1 %v1856_v58  ;;  %v1877_v13 = vld [vmem:[#allocation8 + $0xc0] ss:$8 sps:$4 sm:$0xff]  }
 0x1c8   :  { %1256 = vmatprep.subr.bf16.mxu0 %v1837_v23  ;;  %v1885_v23 = vld [vmem:[#allocation8 + $0xb4] ss:$8 sps:$4 sm:$0xff]  }
 0x1cb   :  { %1257 = vmatpush1.bf16.msra.mxu0 %v1835_v24  ;;  %v1883_v24 = vld [vmem:[#allocation8 + $0xb0] ss:$8 sps:$4 sm:$0xff]  }
 0x1cc   :  { %1258 = vmatprep.subr.bf16.mxu0 %v1843_v49  ;;  %v1892_v49 = vld [vmem:[#allocation6 + $0xa0] ss:$8 sps:$4 sm:$0xff]  }
 0x1cf   :  { %1259 = vmatpush1.bf16.msra.mxu0 %v1841_v56  ;;  %v1897_v56 = vld [vmem:[#allocation8 + $0x94] ss:$8 sps:$4 sm:$0xff]  }
 0x1d0   :  { %1260 = vmatprep.subr.bf16.mxu0 %v1849_v46  ;;  %v1903_v46 = vld [vmem:[#allocation8 + $0x84] ss:$8 sps:$4 sm:$0xff]  }
 0x1d3   :  { %1261 = vmatpush1.bf16.msra.mxu0 %v1847_v47  ;;  %v1906_v47 = vld [vmem:[#allocation6 + $0x84] ss:$8 sps:$4 sm:$0xff]  }
 0x1d4   :  { %1262 = vmatprep.subr.bf16.mxu0 %v1855_v62 }
 0x1d7   :  { %1263 = vmatpush1.bf16.msra.mxu0 %v1853_v55 }
 0x26a   :  { %v711_v50 = vpop.f32.mrf.mxu1 }
 0x26c   :  { %v1799_v44 = vpop.f32.mrf.mxu1 }
 0x26d   :  { %v1859_v44 = vld [vmem:[#allocation8 + $0xf0] ss:$8 sps:$4 sm:$0xff]  }
 0x27a   :  { %v638_v33 = vpop.f32.mrf.mxu0 }
 0x27b   :  { %v712_v48 = vadd.f32 %v711_v50, %v638_v33  ;;  %v1861_v50 = vld [vmem:[#allocation8 + $0xf4] ss:$8 sps:$4 sm:$0xff]  }
 0x27c   :  { %v1794_v42 = vpop.f32.mrf.mxu0  ;;  %1264 = vmatprep.subr.bf16.mxu0 %v1861_v50  ;;  %v1864_v33 = vld [vmem:[#allocation6 + $0xf4] ss:$8 sps:$4 sm:$0xff]  }
 0x27d   :  { %v1687_v60 = vmul.f32 -1.442695, %v712_v48  ;;  %1265 = vmatpush2.bf16.msra.mxu0 %v1859_v44  ;;  %v1862_v48 = vld [vmem:[#allocation6 + $0xf0] ss:$8 sps:$4 sm:$0xff]   ;;  %1491 = vmatprep.subr.bf16.mxu1 %v1864_v33  ;;  %v1867_v42 = vld [vmem:[#allocation8 + $0xe4] ss:$8 sps:$4 sm:$0xff]  }
 0x27e   :  { %1492 = vmatpush2.bf16.msra.mxu1 %v1862_v48  ;;  %1266 = vmatprep.subr.bf16.mxu0 %v1867_v42 }
 0x27f   :  { %1907 = vpow2.f32 %v1687_v60  ;;  %v1865_v60 = vld [vmem:[#allocation8 + $0xe0] ss:$8 sps:$4 sm:$0xff]  }
 0x281   :  { %1267 = vmatpush2.bf16.msra.mxu0 %v1865_v60 }
 0x282   :  { %1268 = vmatprep.subr.bf16.mxu0 %v1873_v3 }
 0x285   :  { %1269 = vmatpush2.bf16.msra.mxu0 %v1871_v7 }
 0x286   :  { %1270 = vmatprep.subr.bf16.mxu0 %v1879_v11 }
 0x289   :  { %1271 = vmatpush2.bf16.msra.mxu0 %v1877_v13 }
 0x28a   :  { %1272 = vmatprep.subr.bf16.mxu0 %v1885_v23 }
 0x28c   :  { %v1908_v1 = vpop.eup %1907 }
 0x28d   :  { %v718_v63 = vadd.f32 1.0, %v1908_v1  ;;  %v1870_v1 = vld [vmem:[#allocation6 + $0xe4] ss:$8 sps:$4 sm:$0xff]   ;;  %1273 = vmatpush2.bf16.msra.mxu0 %v1883_v24 }
 0x28e   :  { %1493 = vmatprep.subr.bf16.mxu1 %v1870_v1  ;;  %1274 = vmatprep.subr.bf16.mxu0 %v1891_v26 }
 0x28f   :  { %1909 = vrcp.f32 %v718_v63  ;;  %v1868_v63 = vld [vmem:[#allocation6 + $0xe0] ss:$8 sps:$4 sm:$0xff]  }
 0x290   :  { %1494 = vmatpush2.bf16.msra.mxu1 %v1868_v63 }
 0x291   :  { %1495 = vmatprep.subr.bf16.mxu1 %v1876_v38 }
 0x294   :  { %1496 = vmatpush2.bf16.msra.mxu1 %v1874_v10 }
 0x295   :  { %1497 = vmatprep.subr.bf16.mxu1 %v1882_v17 }
 0x298   :  { %1498 = vmatpush2.bf16.msra.mxu1 %v1880_v37 }
 0x299   :  { %1499 = vmatprep.subr.bf16.mxu1 %v1888_v53 }
 0x29c   :  { %v1910_v25 = vpop.eup %1909 }
 0x29d   :  { %v724_v27 = vrot.slane %v1910_v25, %v2288_v22  ;;  %v743_v41 = vrot.slane %v1910_v25, %v2292_v16  ;;  %v762_v45 = vrot.slane %v1910_v25, %v761_v30  ;;  %v781_v59 = vrot.slane %v1910_v25, %v780_v54  ;;  %v1886_v25 = vld [vmem:[#allocation6 + $0xb0] ss:$8 sps:$4 sm:$0xff]   ;;  %v1894_v30 = vld [vmem:[#allocation6 + $0xa4] ss:$8 sps:$4 sm:$0xff]  }
 0x29e   :  { %1500 = vmatpush2.bf16.msra.mxu1 %v1886_v25 }
 0x29f   :  { %730 = vbcast.lane.b32.xlu1 %v724_v27, 264  ;;  %726 = vbcast.lane.b32.xlu0 %v724_v27, 256 }
 0x2a0   :  { %1501 = vmatprep.subr.bf16.mxu1 %v1894_v30 }
 0x2a2   :  { %1502 = vmatpush2.bf16.msra.mxu1 %v1892_v49 }
 0x2a3   :  { %745 = vbcast.lane.b32.xlu1 %v743_v41, 256  ;;  %764 = vbcast.lane.b32.xlu0 %v762_v45, 256 }
 0x2a7   :  { %749 = vbcast.lane.b32.xlu1 %v743_v41, 264  ;;  %734 = vbcast.lane.b32.xlu0 %v724_v27, 272 }
 0x2ab   :  { %768 = vbcast.lane.b32.xlu1 %v762_v45, 264  ;;  %783 = vbcast.lane.b32.xlu0 %v781_v59, 256 }
 0x2af   :  { %753 = vbcast.lane.b32.xlu1 %v743_v41, 272  ;;  %772 = vbcast.lane.b32.xlu0 %v762_v45, 272 }
 0x2b3   :  { %787 = vbcast.lane.b32.xlu1 %v781_v59, 264  ;;  %757 = vbcast.lane.b32.xlu0 %v743_v41, 280  ;;  %v1900_v41 = vld [vmem:[#allocation6 + $0x94] ss:$8 sps:$4 sm:$0xff]  }
 0x2b4   :  { %1503 = vmatprep.subr.bf16.mxu1 %v1900_v41  ;;  %v1921_v41 = vld [vmem:[#allocation3 + $0x70] sm:$0xff] }
 0x2b5   :  { %1504 = vmatpush2.bf16.msra.mxu1 %v1898_v34 }
 0x2b6   :  { %1505 = vmatprep.subr.bf16.mxu1 %v1906_v47 }
 0x2b7   :  { %738 = vbcast.lane.b32.xlu1 %v724_v27, 280  ;;  %776 = vbcast.lane.b32.xlu0 %v762_v45, 280  ;;  %v1889_v27 = vld [vmem:[#allocation8 + $0xa0] ss:$8 sps:$4 sm:$0xff]  }
 0x2b8   :  { %1275 = vmatpush2.bf16.msra.mxu0 %v1889_v27  ;;  %v1901_v45 = vld [vmem:[#allocation8 + $0x80] ss:$8 sps:$4 sm:$0xff]  }
 0x2b9   :  { %1276 = vmatprep.subr.bf16.mxu0 %v1897_v56  ;;  %1506 = vmatpush2.bf16.msra.mxu1 %v1904_v51 }
 0x2bb   :  { %791 = vbcast.lane.b32.xlu1 %v781_v59, 272 }
 0x2bc   :  { %1277 = vmatpush2.bf16.msra.mxu0 %v1895_v61 }
 0x2bd   :  { %1278 = vmatprep.subr.bf16.mxu0 %v1903_v46  ;;  %v1922_v46 = vld [vmem:[#allocation3 + $0x78] sm:$0xff] }
 0x2bf   :  { %795 = vbcast.lane.b32.xlu1 %v781_v59, 280 }
 0x2c0   :  { %1279 = vmatpush2.bf16.msra.mxu0 %v1901_v45 }
 0x311   :  { %v731_v39 = vpop.permute.xlu1 %730  ;;  %v727_v54 = vpop.permute.xlu0 %726 }
 0x312   :  { %v2298_v59 = vmul.f32 %v731_v39, %v2086_v8  ;;  %v2301_v50 = vmul.f32 %v727_v54, %v2075_v2  ;;  %v2304_v44 = vmul.f32 %v731_v39, %v2088_v9  ;;  %v2307_v33 = vmul.f32 %v727_v54, %v2078_v4 }
 0x314   :  { %v829_v1 = vadd.f32 %v2298_v59, %v2301_v50  ;;  %v838_v2 = vadd.f32 %v2304_v44, %v2307_v33  ;;  %v918_v63 = vmax.f32 %v2301_v50, %v2298_v59  ;;  %v927_v3 = vmax.f32 %v2307_v33, %v2304_v44 }
 0x315   :  { %v746_v62 = vpop.permute.xlu1 %745  ;;  %v765_v55 = vpop.permute.xlu0 %764 }
 0x316   :  { %v2320_v9 = vmul.f32 %v746_v62, %v2073_v0  ;;  %v2335_v38 = vmul.f32 %v765_v55, %v2107_v20  ;;  %v2338_v0 = vmul.f32 %v765_v55, %v2109_v21 }
 0x318   :  { %2582 = vst [vmem:[#allocation13_spill] sm:$0xff] %v2335_v38  ;;  %2583 = vst [vmem:[#allocation14_spill] sm:$0xff] %v2338_v0 }
 0x319   :  { %v750_v57 = vpop.permute.xlu1 %749  ;;  %v735_v58 = vpop.permute.xlu0 %734 }
 0x31a   :  { %v2310_v48 = vmul.f32 %v750_v57, %v2080_v5  ;;  %v2315_v8 = vmul.f32 %v750_v57, %v2082_v6  ;;  %v2323_v4 = vmul.f32 %v735_v58, %v2096_v14  ;;  %v2326_v5 = vmul.f32 %v735_v58, %v2098_v15  ;;  %v1919_v6 = vld [vmem:[#allocation3 + $0x48] sm:$0xff] }
 0x31b   :  { %v2332_v7 = vmul.f32 %v1919_v6, %v746_v62 }
 0x31c   :  { %v847_v14 = vadd.f32 %v2310_v48, %v2320_v9  ;;  %v936_v20 = vmax.f32 %v2320_v9, %v2310_v48  ;;  %v839_v23 = vadd.f32 %v838_v2, %v2326_v5  ;;  %v919_v25 = vmax.f32 %v918_v63, %v2323_v4 }
 0x31d   :  { %v769_v42 = vpop.permute.xlu1 %768  ;;  %v784_v60 = vpop.permute.xlu0 %783  ;;  %v856_v17 = vadd.f32 %v2315_v8, %v2332_v7  ;;  %v945_v21 = vmax.f32 %v2332_v7, %v2315_v8  ;;  %v928_v26 = vmax.f32 %v927_v3, %v2326_v5 }
 0x31e   :  { %v2343_v15 = vmul.f32 %v769_v42, %v2103_v18  ;;  %v2346_v10 = vmul.f32 %v769_v42, %v2105_v19  ;;  %v830_v18 = vadd.f32 %v829_v1, %v2323_v4  ;;  %v1920_v19 = vld [vmem:[#allocation3 + $0x68] sm:$0xff]  ;;  %v2367_v27 = vmul.f32 %v784_v60, %v2115_v28 }
 0x31f   :  { %v2379_v56 = vmul.f32 %v784_v60, %v2117_v29 }
 0x320   :  { %2584 = vst [vmem:[#allocation15_spill] sm:$0xff] %v2343_v15  ;;  %2585 = vst [vmem:[#allocation16_spill] sm:$0xff] %v2346_v10  ;;  %v865_v30 = vadd.f32 %v2343_v15, %v2335_v38  ;;  %v874_v49 = vadd.f32 %v2346_v10, %v2338_v0  ;;  %v963_v28 = vmax.f32 %v2338_v0, %v2346_v10 }
 0x321   :  { %v754_v11 = vpop.permute.xlu1 %753  ;;  %v773_v13 = vpop.permute.xlu0 %772 }
 0x322   :  { %v2355_v37 = vmul.f32 %v754_v11, %v2094_v12  ;;  %v2359_v24 = vmul.f32 %v1920_v19, %v754_v11  ;;  %v2362_v53 = vmul.f32 %v773_v13, %v2119_v31  ;;  %v2370_v12 = vmul.f32 %v773_v13, %v2121_v32  ;;  %v1924_v13 = vld [vmem:[#allocation3 + $0x38] sm:$0xff] }
 0x323   :  { %v954_v31 = vmax.f32 %v2335_v38, %v2343_v15 }
 0x324   :  { %2586 = vst [vmem:[#allocation17_spill] sm:$0xff] %v2362_v53  ;;  %2587 = vst [vmem:[#allocation18_spill] sm:$0xff] %v2370_v12  ;;  %v848_v32 = vadd.f32 %v847_v14, %v2355_v37  ;;  %v857_v51 = vadd.f32 %v856_v17, %v2359_v24  ;;  %v937_v39 = vmax.f32 %v936_v20, %v2355_v37  ;;  %v1923_v14 = vld [vmem:[#allocation3 + $0x30] sm:$0xff] }
 0x325   :  { %v788_v61 = vpop.permute.xlu1 %787  ;;  %v758_v34 = vpop.permute.xlu0 %757  ;;  %v946_v29 = vmax.f32 %v945_v21, %v2359_v24  ;;  %v2392_v54 = vadd.f32 %v865_v30, %v2362_v53  ;;  %v2395_v62 = vadd.f32 %v874_v49, %v2370_v12  ;;  %v2398_v55 = vmax.f32 %v954_v31, %v2362_v53 }
 0x326   :  { %v2384_v45 = vmul.f32 %v1921_v41, %v758_v34  ;;  %v2386_v47 = vmul.f32 %v1922_v46, %v758_v34  ;;  %v2401_v57 = vmax.f32 %v963_v28, %v2370_v12  ;;  %v2404_v58 = vmul.f32 %v788_v61, %v2125_v35 }
 0x327   :  { %v2411_v6 = vmul.f32 %v788_v61, %v2127_v36 }
 0x328   :  { %2588 = vst [vmem:[#allocation19_spill] sm:$0xff] %v2384_v45  ;;  %2589 = vst [vmem:[#allocation20_spill] sm:$0xff] %v2386_v47  ;;  %v849_v42 = vadd.f32 %v848_v32, %v2384_v45  ;;  %v858_v60 = vadd.f32 %v857_v51, %v2386_v47  ;;  %v938_v1 = vmax.f32 %v937_v39, %v2384_v45 }
 0x329   :  { %v947_v2 = vmax.f32 %v946_v29, %v2386_v47  ;;  %v739_v63 = vpop.permute.xlu1 %738  ;;  %v777_v3 = vpop.permute.xlu0 %776 }
 0x32a   :  { %v2413_v11 = vmul.f32 %v1923_v14, %v739_v63  ;;  %v2415_v17 = vmul.f32 %v1924_v13, %v739_v63  ;;  %v2418_v35 = vmul.f32 %v777_v3, %v2135_v40  ;;  %v850_v20 = vrot.slane %v849_v42, 4 }
 0x32b   :  { %v859_v21 = vrot.slane %v858_v60, 4  ;;  %v939_v19 = vrot.slane %v938_v1, 4  ;;  %v948_v30 = vrot.slane %v947_v2, 4 }
 0x32c   :  { %v831_v49 = vadd.f32 %v830_v18, %v2413_v11  ;;  %v840_v31 = vadd.f32 %v839_v23, %v2415_v17  ;;  %v920_v36 = vmax.f32 %v919_v25, %v2413_v11  ;;  %v929_v61 = vmax.f32 %v928_v26, %v2415_v17 }
 0x32d   :  { %v851_v34 = vadd.f32 %v850_v20, %v849_v42  ;;  %v860_v28 = vadd.f32 %v859_v21, %v858_v60  ;;  %v940_v32 = vmax.f32 %v938_v1, %v939_v19  ;;  %v949_v41 = vmax.f32 %v947_v2, %v948_v30 }
 0x32e   :  { %v832_v46 = vrot.slane %v831_v49, 4  ;;  %v841_v51 = vrot.slane %v840_v31, 4  ;;  %v921_v40 = vrot.slane %v920_v36, 4  ;;  %v930_v39 = vrot.slane %v929_v61, 4 }
 0x32f   :  { %v852_v29 = vrot.slane %v851_v34, 2  ;;  %v861_v63 = vrot.slane %v860_v28, 2  ;;  %v941_v14 = vrot.slane %v940_v32, 2  ;;  %v950_v13 = vrot.slane %v949_v41, 2 }
 0x330   :  { %v833_v12 = vadd.f32 %v832_v46, %v831_v49  ;;  %v842_v18 = vadd.f32 %v841_v51, %v840_v31  ;;  %v922_v53 = vmax.f32 %v920_v36, %v921_v40  ;;  %v931_v23 = vmax.f32 %v929_v61, %v930_v39 }
 0x331   :  { %v853_v10 = vadd.f32 %v852_v29, %v851_v34  ;;  %v862_v25 = vadd.f32 %v861_v63, %v860_v28  ;;  %v942_v15 = vmax.f32 %v940_v32, %v941_v14  ;;  %v951_v26 = vmax.f32 %v949_v41, %v950_v13  ;;  %v792_v34 = vpop.permute.xlu1 %791 }
 0x332   :  { %v834_v42 = vrot.slane %v833_v12, 2  ;;  %v843_v60 = vrot.slane %v842_v18, 2  ;;  %v923_v1 = vrot.slane %v922_v53, 2  ;;  %v932_v2 = vrot.slane %v931_v23, 2 }
 0x333   :  { %v854_v20 = vrot.slane %v853_v10, 1  ;;  %v863_v21 = vrot.slane %v862_v25, 1  ;;  %v943_v19 = vrot.slane %v942_v15, 1  ;;  %v952_v30 = vrot.slane %v951_v26, 1 }
 0x334   :  { %v835_v0 = vadd.f32 %v834_v42, %v833_v12  ;;  %v844_v38 = vadd.f32 %v843_v60, %v842_v18  ;;  %v924_v47 = vmax.f32 %v922_v53, %v923_v1  ;;  %v933_v45 = vmax.f32 %v931_v23, %v932_v2  ;;  %v1925_v12 = vld [vmem:[#allocation3 + $0xb8] sm:$0xff] }
 0x335   :  { %v855_v49 = vadd.f32 %v854_v20, %v853_v10  ;;  %v864_v31 = vadd.f32 %v863_v21, %v862_v25  ;;  %v944_v36 = vmax.f32 %v942_v15, %v943_v19  ;;  %v2424_v61 = vmax.f32 %v951_v26, %v952_v30  ;;  %v796_v60 = vpop.permute.xlu1 %795 }
 0x336   :  { %v836_v28 = vrot.slane %v835_v0, 1  ;;  %v845_v32 = vrot.slane %v844_v38, 1  ;;  %v925_v41 = vrot.slane %v924_v47, 1  ;;  %v934_v46 = vrot.slane %v933_v45, 1 }
 0x337   :  { %v883_v51 = vadd.f32 %v2404_v58, %v2367_v27  ;;  %v2428_v40 = vmul.f32 0.03125, %v855_v49  ;;  %v2430_v39 = vmul.f32 0.03125, %v864_v31  ;;  %v2432_v53 = vmul.f32 %v1925_v12, %v777_v3  ;;  %v1926_v49 = vld [vmem:[#allocation3 + $0xe0] sm:$0xff] }
 0x338   :  { %v992_v10 = vpack.c.bf16 %v944_v36, %v944_v36  ;;  %v837_v29 = vadd.f32 %v836_v28, %v835_v0  ;;  %v846_v15 = vadd.f32 %v845_v32, %v844_v38  ;;  %v2434_v63 = vmax.f32 %v924_v47, %v925_v41  ;;  %v1927_v36 = vld [vmem:[#allocation3 + $0xe8] sm:$0xff] }
 0x339   :  { %v892_v14 = vadd.f32 %v2411_v6, %v2379_v56  ;;  %v972_v13 = vmax.f32 %v2367_v27, %v2404_v58  ;;  %v981_v18 = vmax.f32 %v2379_v56, %v2411_v6  ;;  %v867_v23 = vadd.f32 %v2392_v54, %v2418_v35 }
 0x33a   :  { %v2450_v47 = vmax.f32 %v933_v45, %v934_v46  ;;  %v2452_v25 = vmul.f32 0.03125, %v837_v29  ;;  %v876_v42 = vadd.f32 %v2395_v62, %v2432_v53  ;;  %v956_v54 = vmax.f32 %v2398_v55, %v2418_v35 }
 0x33b   :  { %v868_v26 = vrot.slane %v867_v23, 4  ;;  %v2458_v1 = vunpack.c.l.b16 %v992_v10  ;;  %v2460_v2 = vmul.f32 0.03125, %v846_v15  ;;  %v990_v20 = vpack.c.bf16 %v2434_v63, %v2434_v63 }
 0x33c   :  { %v965_v45 = vmax.f32 %v2401_v57, %v2432_v53  ;;  %v877_v19 = vrot.slane %v876_v42, 4  ;;  %v957_v30 = vrot.slane %v956_v54, 4  ;;  %v2466_v31 = vmul.f32 %v1926_v49, %v792_v34  ;;  %v1928_v49 = vld [vmem:[#allocation3 + $0xf8] sm:$0xff] }
 0x33d   :  { %v869_v21 = vadd.f32 %v868_v26, %v867_v23  ;;  %v2470_v28 = vmul.f32 %v1927_v36, %v792_v34  ;;  %v2473_v32 = vmul.f32 %v796_v60, %v2148_v52  ;;  %v910_v41 = vpack.c.bf16 %v2452_v25, %v2452_v25 }
 0x33e   :  { %v966_v55 = vrot.slane %v965_v45, 4  ;;  %v878_v46 = vadd.f32 %v877_v19, %v876_v42  ;;  %v958_v12 = vmax.f32 %v956_v54, %v957_v30  ;;  %v884_v29 = vadd.f32 %v883_v51, %v2466_v31 }
 0x33f   :  { %2590 = vst [vmem:[#allocation21_spill] sm:$0xff] %v2470_v28  ;;  %2591 = vst [vmem:[#allocation22_spill] sm:$0xff] %v2473_v32  ;;  %v870_v57 = vrot.slane %v869_v21, 2  ;;  %v893_v15 = vadd.f32 %v892_v14, %v2470_v28  ;;  %v973_v63 = vmax.f32 %v972_v13, %v2466_v31  ;;  %v2480_v36 = vmul.f32 %v1928_v49, %v796_v60 }
 0x340   :  { %v967_v10 = vmax.f32 %v965_v45, %v966_v55  ;;  %v879_v26 = vrot.slane %v878_v46, 2  ;;  %v959_v34 = vrot.slane %v958_v12, 2  ;;  %v982_v38 = vmax.f32 %v981_v18, %v2470_v28 }
 0x341   :  { %v871_v23 = vadd.f32 %v870_v57, %v869_v21  ;;  %2592 = vst [vmem:[#allocation23_spill] sm:$0xff] %v2480_v36  ;;  %v885_v25 = vadd.f32 %v884_v29, %v2473_v32  ;;  %v974_v42 = vmax.f32 %v973_v63, %v2473_v32  ;;  %v894_v14 = vadd.f32 %v893_v15, %v2480_v36 }
 0x342   :  { %v968_v52 = vrot.slane %v967_v10, 2  ;;  %v880_v45 = vadd.f32 %v879_v26, %v878_v46  ;;  %v960_v51 = vmax.f32 %v958_v12, %v959_v34  ;;  %v983_v30 = vmax.f32 %v982_v38, %v2480_v36 }
 0x343   :  { %v872_v54 = vrot.slane %v871_v23, 1  ;;  %v886_v13 = vrot.slane %v885_v25, 4  ;;  %v975_v21 = vrot.slane %v974_v42, 4  ;;  %v895_v49 = vrot.slane %v894_v14, 4 }
 0x344   :  { %v969_v19 = vmax.f32 %v967_v10, %v968_v52  ;;  %v881_v60 = vrot.slane %v880_v45, 1  ;;  %v961_v57 = vrot.slane %v960_v51, 1  ;;  %v984_v29 = vrot.slane %v983_v30, 4 }
 0x345   :  { %v873_v55 = vadd.f32 %v872_v54, %v871_v23  ;;  %v887_v18 = vadd.f32 %v886_v13, %v885_v25  ;;  %v976_v62 = vmax.f32 %v974_v42, %v975_v21  ;;  %v896_v46 = vadd.f32 %v895_v49, %v894_v14 }
 0x346   :  { %v970_v0 = vrot.slane %v969_v19, 1  ;;  %v882_v3 = vadd.f32 %v881_v60, %v880_v45  ;;  %v962_v32 = vmax.f32 %v960_v51, %v961_v57  ;;  %v985_v10 = vmax.f32 %v983_v30, %v984_v29 }
 0x347   :  { %v906_v63 = vmul.f32 0.03125, %v873_v55  ;;  %v888_v26 = vrot.slane %v887_v18, 2  ;;  %v977_v15 = vrot.slane %v976_v62, 2  ;;  %v2593_v34 = vpack.c.bf16 %v2428_v40, %v2428_v40 }
 0x348   :  { %v971_v12 = vmax.f32 %v969_v19, %v970_v0  ;;  %v907_v23 = vmul.f32 0.03125, %v882_v3  ;;  %v994_v52 = vpack.c.bf16 %v962_v32, %v962_v32  ;;  %v897_v54 = vrot.slane %v896_v46, 2 }
 0x349   :  { %v1299_v38 = vunpack.c.l.b16 %v2593_v34  ;;  %v914_v36 = vpack.c.bf16 %v906_v63, %v906_v63  ;;  %v889_v28 = vadd.f32 %v888_v26, %v887_v18  ;;  %v978_v25 = vmax.f32 %v976_v62, %v977_v15 }
 0x34a   :  { %v986_v42 = vrot.slane %v985_v10, 2  ;;  %v911_v45 = vpack.c.bf16 %v2460_v2, %v2460_v2  ;;  %v1070_v51 = vunpack.c.l.b16 %v990_v20  ;;  %v898_v14 = vadd.f32 %v897_v54, %v896_v46 }
 0x34b   :  { %v995_v0 = vpack.c.bf16 %v971_v12, %v971_v12  ;;  %v1297_v19 = vunpack.c.l.b16 %v910_v41  ;;  %v890_v13 = vrot.slane %v889_v28, 1  ;;  %v979_v21 = vrot.slane %v978_v25, 1 }
 0x34c   :  { %v987_v30 = vmax.f32 %v985_v10, %v986_v42  ;;  %v1074_v55 = vunpack.c.l.b16 %v994_v52  ;;  %v899_v40 = vrot.slane %v898_v14, 1  ;;  %v2594_v3 = vpack.c.bf16 %v2450_v47, %v2450_v47 }
 0x34d   :  { %v915_v60 = vpack.c.bf16 %v907_v23, %v907_v23  ;;  %v1301_v57 = vunpack.c.l.b16 %v914_v36  ;;  %v891_v62 = vadd.f32 %v890_v13, %v889_v28  ;;  %v980_v49 = vmax.f32 %v978_v25, %v979_v21 }
 0x34e   :  { %v1071_v32 = vunpack.c.l.b16 %v2594_v3  ;;  %v988_v18 = vrot.slane %v987_v30, 1  ;;  %v2595_v2 = vpack.c.bf16 %v2424_v61, %v2424_v61  ;;  %v1075_v29 = vunpack.c.l.b16 %v995_v0 }
 0x34f   :  { %v900_v41 = vadd.f32 %v899_v40, %v898_v14  ;;  %v1298_v63 = vunpack.c.l.b16 %v911_v45  ;;  %v908_v46 = vmul.f32 0.03125, %v891_v62  ;;  %v996_v12 = vpack.c.bf16 %v980_v49, %v980_v49 }
 0x350   :  { %v1073_v20 = vunpack.c.l.b16 %v2595_v2  ;;  %v989_v26 = vmax.f32 %v987_v30, %v988_v18  ;;  %v1078_v15 = vsel %vm316_vm4, %v2458_v1, %v1070_v51  ;;  %v2596_v28 = vpack.c.bf16 %v2430_v39, %v2430_v39 }
 0x351   :  { %v909_v10 = vmul.f32 0.03125, %v900_v41  ;;  %v1302_v34 = vunpack.c.l.b16 %v915_v60  ;;  %v916_v23 = vpack.c.bf16 %v908_v46, %v908_v46  ;;  %v1076_v61 = vunpack.c.l.b16 %v996_v12 }
 0x352   :  { %v1081_v47 = vsel %vm316_vm4, %v1073_v20, %v1071_v32  ;;  %v1300_v36 = vunpack.c.l.b16 %v2596_v28  ;;  %v997_v52 = vpack.c.bf16 %v989_v26, %v989_v26  ;;  %v1305_v54 = vsel %vm316_vm4, %v1299_v38, %v1297_v19 }
 0x353   :  { %v1079_v25 = vsel %vm318_vm5, %v1074_v55, %v1078_v15  ;;  %v917_v42 = vpack.c.bf16 %v909_v10, %v909_v10  ;;  %v1303_v51 = vunpack.c.l.b16 %v916_v23  ;;  %v1082_v0 = vsel %vm318_vm5, %v1075_v29, %v1081_v47 }
 0x354   :  { %v1308_v45 = vsel %vm316_vm4, %v1300_v36, %v1298_v63  ;;  %v1077_v14 = vunpack.c.l.b16 %v997_v52  ;;  %v1080_v1 = vsel %vm320_vm6, %v1076_v61, %v1079_v25  ;;  %v1306_v39 = vsel %vm318_vm5, %v1301_v57, %v1305_v54 }
 0x355   :  { %v1304_v13 = vunpack.c.l.b16 %v917_v42  ;;  %v1084_v30 = vpack.c.b16 %v1080_v1, %v1080_v1  ;;  %v1309_v40 = vsel %vm318_vm5, %v1302_v34, %v1308_v45  ;;  %v1307_v38 = vsel %vm320_vm6, %v1303_v51, %v1306_v39 }
 0x356   :  { %v1083_v21 = vsel %vm320_vm6, %v1077_v14, %v1082_v0  ;;  %v1311_v3 = vpack.c.b16 %v1307_v38, %v1307_v38  ;;  %v1517_v57 = vstv %s2569_s5  ;;  %v2024_v23 = vmov 1966171168   ;;  %s2025_s5 = smov [#allocation9]  }
 0x357   :  { %v1085_v19 = vpack.c.b16 %v1083_v21, %v1083_v21  ;;  %v1310_v55 = vsel %vm320_vm6, %v1304_v13, %v1309_v40  ;;  %v1536_v61 = vunpack.c.l.s4 %v2024_v23  ;;  %s1668_s23 = sshll.u32 %s2025_s5, 4  ;;  %s1669_s23 = int_to_ptr.vmem [resolvable:$true] %s1668_s23 }
 0x358   :  { %v1312_v32 = vpack.c.b16 %v1310_v55, %v1310_v55  ;;  %s1989_s24 = scalar_lea.vmem %s1669_s23, 4096  ;;  %p1994_p2 = scmp.lt.s32.totalorder %s1669_s23, %s1669_s23 }
 0x359   :  { %1280 = vmatprep.mubr.bf16.mxu0 %v1085_v19  ;;  %v1537_v52 = vunpack.c.0.s8 %v1536_v61  ;;  %v2606_v61 = vld [vmem:[#allocation22_spill] sm:$0xff]  ;;  %p1990_p1 = scmp.ne.s32.totalorder %s1669_s23, %s1989_s24  ;;  %p1995_p3 = scmp.lt.s32.totalorder %s1989_s24, %s1989_s24 }
 0x35a   :  { %1281 = vmatmul.mubr.bf16.vlgmr.msra.gmra.mxu0 %v1084_v30  ;;  %1507 = vmatprep.mubr.bf16.mxu1 %v1312_v32 }
 0x35b   :  { %1508 = vmatmul.mubr.bf16.vlgmr.msra.gmra.mxu1 %v1311_v3  ;;  %v1540_v25 = vsub.s32 %v1537_v52, %v2191_v43  ;;  %v2607_v52 = vld [vmem:[#allocation23_spill] sm:$0xff]  ;;  %p1996_p4 = por %p1995_p3, %p1994_p2 }
 0x35d   :  { %p1997_p5 = pnand %p1996_p4, %p1990_p1 }
 0x41a   :  { %v1282_v60 = vpop.f32.mrf.mxu0 }
 0x41b   :  { %v1509_v62 = vpop.f32.mrf.mxu1 }
 0x41c   :  { %v1284_v49 = vpop.f32.mrf.mxu0  ;;  %v1510_v18 = vadd.f32 %v1509_v62, %v1282_v60 }
 0x41d   :  { %v1511_v2 = vpop.f32.mrf.mxu1 }
 0x41e   :  { %v1518_v20 = vadd.f32 %v1517_v57, %v1510_v18  ;;  %v1286_v29 = vpop.f32.mrf.mxu0  ;;  %v1512_v41 = vadd.f32 %v1511_v2, %v1284_v49 }
 0x41f   :  { %v1513_v63 = vpop.f32.mrf.mxu1 }
 0x420   :  { %v1752_v46 = vmul.f32 -1.442695, %v1518_v20  ;;  %v1519_v12 = vadd.f32 %v1517_v57, %v1512_v41  ;;  %v1287_v26 = vpop.f32.mrf.mxu0  ;;  %v2601_v41 = vld [vmem:[#allocation15_spill] sm:$0xff]  ;;  %v2602_v63 = vld [vmem:[#allocation16_spill] sm:$0xff] }
 0x421   :  { %v1514_v15 = vpop.f32.mrf.mxu1 }
 0x422   :  { %1911 = vpow2.f32 %v1752_v46  ;;  %v1753_v47 = vmul.f32 -1.442695, %v1519_v12  ;;  %v2603_v46 = vld [vmem:[#allocation17_spill] sm:$0xff] }
 0x424   :  { %1913 = vpow2.f32 %v1753_v47 }
 0x42f   :  { %v1912_v10 = vpop.eup %1911 }
 0x430   :  { %v1526_v28 = vadd.f32 1.0, %v1912_v10 }
 0x431   :  { %v1914_v36 = vpop.eup %1913 }
 0x432   :  { %v1527_v34 = vadd.f32 1.0, %v1914_v36  ;;  %1915 = vrcp.f32 %v1526_v28 }
 0x434   :  { %1917 = vrcp.f32 %v1527_v34 }
 0x43f   :  { %v1916_v54 = vpop.eup %1915 }
 0x441   :  { %v1918_v42 = vpop.eup %1917 }
 0x442   :  { %v1534_v45 = vcombine.low %v1916_v54, %v1918_v42 }
 0x444   :  { %v1541_v14 = vrot.slane %v1534_v45, %v1540_v25 }
 0x446   :  { %v1542_v1 = vcombine.high %v1541_v14, %v1541_v14  ;;  %v1549_v51 = vrot.slane %v1541_v14, %v1540_v25 }
 0x448   :  { %v1556_v0 = vrot.slane %v1542_v1, %v1540_v25  ;;  %v1557_v13 = vcombine.high %v1549_v51, %v1549_v51  ;;  %v1562_v39 = vrot.slane %v1549_v51, %v2288_v22  ;;  %v1566_v21 = vrot.slane %v1549_v51, %v2292_v16 }
 0x44a   :  { %v1558_v30 = vcombine.high %v1556_v0, %v1556_v0  ;;  %v1570_v40 = vrot.slane %v1556_v0, %v2288_v22  ;;  %v1574_v38 = vrot.slane %v1556_v0, %v2292_v16  ;;  %v1578_v19 = vrot.slane %v1557_v13, %v2288_v22 }
 0x44b   :  { %v1582_v43 = vrot.slane %v1557_v13, %v2292_v16  ;;  %v1599_v55 = vmul.f32 %v1562_v39, %v2301_v50  ;;  %v1600_v3 = vmul.f32 %v1566_v21, %v2307_v33  ;;  %v1601_v32 = vmul.f32 %v1562_v39, %v2298_v59 }
 0x44c   :  { %v1586_v60 = vrot.slane %v1558_v30, %v2288_v22  ;;  %v1590_v62 = vrot.slane %v1558_v30, %v2292_v16  ;;  %v1602_v57 = vmul.f32 %v1566_v21, %v2304_v44  ;;  %v1603_v49 = vmul.f32 %v1562_v39, %v2323_v4  ;;  %v2597_v4 = vld [vmem:[#allocation19_spill] sm:$0xff] }
 0x44d   :  { %v1604_v18 = vmul.f32 %v1566_v21, %v2326_v5  ;;  %v1605_v2 = vmul.f32 %v1562_v39, %v2413_v11  ;;  %v1606_v20 = vmul.f32 %v1566_v21, %v2415_v17  ;;  %v1607_v50 = vmul.f32 %v1570_v40, %v2320_v9  ;;  %1631 = vst [vmem:[#allocation9] sm:$0xff] %v1599_v55  ;;  %v2598_v11 = vld [vmem:[#allocation20_spill] sm:$0xff]  ;;  %v2599_v9 = vld [vmem:[#allocation13_spill] sm:$0xff] }
 0x44e   :  { %1632 = vst [vmem:[#allocation9 + $0x8] sm:$0xff] %v1600_v3  ;;  %1633 = vst [vmem:[#allocation9 + $0x10] sm:$0xff] %v1601_v32  ;;  %v1608_v59 = vmul.f32 %v1574_v38, %v2332_v7  ;;  %v1609_v22 = vmul.f32 %v1570_v40, %v2310_v48  ;;  %v1610_v16 = vmul.f32 %v1574_v38, %v2315_v8  ;;  %v2600_v7 = vld [vmem:[#allocation14_spill] sm:$0xff] }
 0x44f   :  { %v1611_v44 = vmul.f32 %v1570_v40, %v2355_v37  ;;  %1634 = vst [vmem:[#allocation9 + $0x18] sm:$0xff] %v1602_v57  ;;  %1635 = vst [vmem:[#allocation9 + $0x20] sm:$0xff] %v1603_v49  ;;  %v1612_v33 = vmul.f32 %v1574_v38, %v2359_v24  ;;  %v1613_v5 = vmul.f32 %v1570_v40, %v2597_v4  ;;  %v2604_v24 = vld [vmem:[#allocation18_spill] sm:$0xff] }
 0x450   :  { %v1614_v17 = vmul.f32 %v1574_v38, %v2598_v11  ;;  %v1615_v29 = vmul.f32 %v1578_v19, %v2599_v9  ;;  %1636 = vst [vmem:[#allocation9 + $0x28] sm:$0xff] %v1604_v18  ;;  %1637 = vst [vmem:[#allocation9 + $0x30] sm:$0xff] %v1605_v2  ;;  %v1616_v48 = vmul.f32 %v1582_v43, %v2600_v7 }
 0x451   :  { %1638 = vst [vmem:[#allocation9 + $0x38] sm:$0xff] %v1606_v20  ;;  %1639 = vst [vmem:[#allocation9 + $0x40] sm:$0xff] %v1607_v50  ;;  %v1617_v8 = vmul.f32 %v1578_v19, %v2601_v41  ;;  %v1618_v37 = vmul.f32 %v1582_v43, %v2602_v63  ;;  %v1619_v12 = vmul.f32 %v1578_v19, %v2603_v46 }
 0x452   :  { %1640 = vst [vmem:[#allocation9 + $0x48] sm:$0xff] %v1608_v59  ;;  %1641 = vst [vmem:[#allocation9 + $0x50] sm:$0xff] %v1609_v22  ;;  %v1620_v26 = vmul.f32 %v1582_v43, %v2604_v24  ;;  %v1621_v15 = vmul.f32 %v1578_v19, %v2418_v35  ;;  %v1622_v47 = vmul.f32 %v1582_v43, %v2432_v53  ;;  %v2605_v35 = vld [vmem:[#allocation21_spill] sm:$0xff] }
 0x453   :  { %1642 = vst [vmem:[#allocation9 + $0x58] sm:$0xff] %v1610_v16  ;;  %1643 = vst [vmem:[#allocation9 + $0x60] sm:$0xff] %v1611_v44  ;;  %v1623_v10 = vmul.f32 %v1586_v60, %v2367_v27  ;;  %v1624_v28 = vmul.f32 %v1590_v62, %v2379_v56  ;;  %v1625_v36 = vmul.f32 %v1586_v60, %v2404_v58 }
 0x454   :  { %1644 = vst [vmem:[#allocation9 + $0x68] sm:$0xff] %v1612_v33  ;;  %1645 = vst [vmem:[#allocation9 + $0x70] sm:$0xff] %v1613_v5  ;;  %v1626_v34 = vmul.f32 %v1590_v62, %v2411_v6  ;;  %v1627_v23 = vmul.f32 %v1586_v60, %v2466_v31  ;;  %v1628_v53 = vmul.f32 %v1590_v62, %v2605_v35 }
 0x455   :  { %1646 = vst [vmem:[#allocation9 + $0x78] sm:$0xff] %v1614_v17  ;;  %1647 = vst [vmem:[#allocation9 + $0x80] sm:$0xff] %v1615_v29  ;;  %v1629_v27 = vmul.f32 %v1586_v60, %v2606_v61  ;;  %v1630_v54 = vmul.f32 %v1590_v62, %v2607_v52 }
 0x456   :  { %1648 = vst [vmem:[#allocation9 + $0x88] sm:$0xff] %v1616_v48  ;;  %1649 = vst [vmem:[#allocation9 + $0x90] sm:$0xff] %v1617_v8 }
 0x457   :  { %1650 = vst [vmem:[#allocation9 + $0x98] sm:$0xff] %v1618_v37  ;;  %1651 = vst [vmem:[#allocation9 + $0xa0] sm:$0xff] %v1619_v12 }
 0x458   :  { %1652 = vst [vmem:[#allocation9 + $0xa8] sm:$0xff] %v1620_v26  ;;  %1653 = vst [vmem:[#allocation9 + $0xb0] sm:$0xff] %v1621_v15 }
 0x459   :  { %1654 = vst [vmem:[#allocation9 + $0xb8] sm:$0xff] %v1622_v47  ;;  %1655 = vst [vmem:[#allocation9 + $0xc0] sm:$0xff] %v1623_v10 }
 0x45a   :  { %1656 = vst [vmem:[#allocation9 + $0xc8] sm:$0xff] %v1624_v28  ;;  %1657 = vst [vmem:[#allocation9 + $0xd0] sm:$0xff] %v1625_v36 }
 0x45b   :  { %1658 = vst [vmem:[#allocation9 + $0xd8] sm:$0xff] %v1626_v34  ;;  %1659 = vst [vmem:[#allocation9 + $0xe0] sm:$0xff] %v1627_v23 }
 0x45c   :  { %1660 = vst [vmem:[#allocation9 + $0xe8] sm:$0xff] %v1628_v53  ;;  %1661 = vst [vmem:[#allocation9 + $0xf0] sm:$0xff] %v1629_v27 }
 0x45d   :  { %1662 = vst [vmem:[#allocation9 + $0xf8] sm:$0xff] %v1630_v54 }
 0x45e   :  { %2000 = shalt.err (!%p1997_p5)
}
 0x45f   :  { %1674 = dma.vmem_to_hbm [thread:$0]  %s1669_s23, 4096, %s2570_s6, [#allocation5], %s2019_s7, %s2019_s7, %s2020_s8  }
 0x460   :  { %2013 = dma.done.wait [#allocation5], 4096  }
 0x461   :  { %2014 = vsyncadd [#allocation5], 4294963200 }
 0x462   :  { %1678 = vsyncpa [#allocation4], 1 }
 0x463   :  { %1679 = vsyncpa [#allocation7], 1 }
 0x464   :  { %1680 = vsyncpa [#allocation5], 1 }

</bundles_post_ra>
